<compile_context>
chip_gen: v7x
topology: tpu7x:2x2x1
jax: 0.10.0
libtpu: 0.0.40
codegen_flags: <defaults>
</compile_context>

<pallas_src>
import jax
import jax.numpy as jnp
from jax import lax
from jax.experimental import pallas as pl
from jax.experimental.pallas import tpu as pltpu


def _make_gcb_kernel(C, H, W, n_block, strips, shared, channel_unroll):
    """Builds the kernel body for fixed static dimensions."""
    static_channels = C <= 8  # fully unroll the channel loop only when tiny

    def kernel(x_ref, wh_ref, wv_ref, b_ref, out_ref, xp_ref):
        # x_ref : (n_block, C, H, W)       VMEM  unpadded input block
        # wh_ref: (C*9,)                   SMEM  Gh weights, [c*9 + dh*3 + dw]
        # wv_ref: (C*9,)                   SMEM  Gv weights (unused if shared)
        # b_ref : (2,)                     SMEM  [bias_h, bias_v]
        # out_ref: (n_block, 1, H, W)      VMEM
        # xp_ref : (n_block, C, H+2, W+2)  VMEM  zero-padded staging scratch

        # Build the zero halo in VMEM (cheap; avoids a jnp.pad HBM pass).
        # Re-initialized every step so the kernel is correct under megacore
        # grid splitting (each core owns its own scratch instance).
        xp_ref[...] = jnp.zeros_like(xp_ref)
        xp_ref[:, :, pl.ds(1, H), pl.ds(1, W)] = x_ref[...]

        b_h = b_ref[0]
        b_v = b_ref[1]
        n_acc = 1 if shared else 2

        for nb in range(n_block):
            for (r0, hs) in strips:

                def accumulate(c, accs, nb=nb, r0=r0, hs=hs):
                    # Load this channel's padded strip once; all 9 taps are
                    # sublane/lane shifts (slices) of that value.
                    plane = xp_ref[nb, c, pl.ds(r0, hs + 2), :]  # (hs+2, W+2)
                    accs = list(accs)
                    for dh in range(3):
                        rows = plane[dh:dh + hs, :]              # (hs, W+2)
                        for dw in range(3):
                            patch = rows[:, dw:dw + W]           # (hs, W)
                            t = dh * 3 + dw
                            accs[0] = accs[0] + patch * wh_ref[c * 9 + t]
                            if not shared:
                                accs[1] = accs[1] + patch * wv_ref[c * 9 + t]
                    return tuple(accs)

                init = tuple(jnp.zeros((hs, W), jnp.float32)
                             for _ in range(n_acc))
                if static_channels:
                    accs = init
                    for c in range(C):
                        accs = accumulate(c, accs)
                else:
                    accs = lax.fori_loop(0, C, accumulate, init,
                                         unroll=channel_unroll)

                if shared:
                    x1 = accs[0] + b_h
                    x2 = accs[0] + b_v
                else:
                    x1 = accs[0] + b_h
                    x2 = accs[1] + b_v
                out_ref[nb, 0, pl.ds(r0, hs), :] = jnp.sqrt(x1 * x1 + x2 * x2)

    return kernel


def gcb_forward(x, w_h, w_v, b_h, b_v, *, shared_weights=None,
                batch_block=None, strip_rows=None, channel_unroll=4):
    """x: (N, C, H, W) f32; w_h, w_v: (1, C, 3, 3); b_h, b_v: scalars."""
    N, C, H, W = x.shape
    x = x.astype(jnp.float32)

    if shared_weights is None:
        # The GCB module sets Gh.weight and Gv.weight to the same tensor `f`.
        shared_weights = w_h is w_v

    # Batch tile: biggest that fits a conservative VMEM budget, but keep at
    # least two (parallel) grid steps when batch >= 2 so both TensorCores are
    # used on megacore parts (v7x).
    if batch_block is None:
        per_image = C * (H + 2) * (W + 2) * 4
        budget = 8 * 1024 * 1024
        nt = max(1, min(N, budget // max(per_image, 1)))
        if N >= 2:
            nt = min(nt, pl.cdiv(N, 2))
        while N % nt:
            nt -= 1
        batch_block = nt
    assert N % batch_block == 0, "batch_block must divide N"

    # H strips keep each f32 accumulator to a handful of vregs.
    if strip_rows is None:
        lane_tiles = pl.cdiv(W, 128)
        strip_rows = max(8, (64 // lane_tiles) // 8 * 8)
    strip_rows = min(strip_rows, H)
    strips = []
    r0 = 0
    while r0 < H:
        strips.append((r0, min(strip_rows, H - r0)))
        r0 += strip_rows

    # Weights flattened per-channel-contiguous: index = c*9 + dh*3 + dw.
    wh_flat = w_h[0].reshape(-1).astype(jnp.float32)
    wv_flat = w_v[0].reshape(-1).astype(jnp.float32)
    bias = jnp.asarray([b_h, b_v], dtype=jnp.float32)

    kernel = _make_gcb_kernel(C, H, W, batch_block, tuple(strips),
                              bool(shared_weights), channel_unroll)

    # Rough per-step VMEM demand (double-buffered in/out + scratch); raise the
    # scoped limit only when needed.  NOTE: on v7x (64 MiB physical VMEM) keep
    # blocks roughly half of a v5e/v6e-tuned configuration.
    in_blk = batch_block * C * H * W * 4
    out_blk = batch_block * H * W * 4
    scratch_bytes = batch_block * C * (H + 2) * (W + 2) * 4
    est = 2 * in_blk + 2 * out_blk + scratch_bytes
    vmem_limit = None
    if est > 12 * 1024 * 1024:
        vmem_limit = int(min(est + 4 * 1024 * 1024, 96 * 1024 * 1024))

    out = pl.pallas_call(
        kernel,
        out_shape=jax.ShapeDtypeStruct((N, 1, H, W), jnp.float32),
        grid_spec=pltpu.PrefetchScalarGridSpec(
            num_scalar_prefetch=0,
            grid=(N // batch_block,),
            in_specs=[
                pl.BlockSpec((batch_block, C, H, W), lambda n: (n, 0, 0, 0)),
                pl.BlockSpec(memory_space=pltpu.MemorySpace.SMEM),
                pl.BlockSpec(memory_space=pltpu.MemorySpace.SMEM),
                pl.BlockSpec(memory_space=pltpu.MemorySpace.SMEM),
            ],
            out_specs=pl.BlockSpec((batch_block, 1, H, W),
                                   lambda n: (n, 0, 0, 0)),
            scratch_shapes=[
                pltpu.VMEM((batch_block, C, H + 2, W + 2), jnp.float32),
            ],
        ),
        compiler_params=pltpu.CompilerParams(
            dimension_semantics=("parallel",),
            vmem_limit_bytes=vmem_limit,
        ),
    )(x, wh_flat, wv_flat, bias)
    return out


def _reference(x, w_h, w_v, b_h, b_v):
    """Pure-JAX reference (NCHW conv, padding=1), for correctness checking."""
    dn = lax.conv_dimension_numbers(x.shape, w_h.shape, ("NCHW", "OIHW", "NCHW"))

    def conv(a, w):
        return lax.conv_general_dilated(a, w, (1, 1), ((1, 1), (1, 1)),
                                        dimension_numbers=dn,
                                        precision=lax.Precision.HIGHEST)

    x1 = conv(x, w_h) + b_h
    x2 = conv(x, w_v) + b_v
    return jnp.sqrt(x1 * x1 + x2 * x2)


if __name__ == "__main__":
    # ---- primary check: module configuration (shared fixed filter f) ----
    N, C, H, W = 2, 4, 16, 16

    key = jax.random.PRNGKey(0)
    kx, kb1, kb2, kx2, kw2a, kw2b, kb3, kb4 = jax.random.split(key, 8)

    x = jax.random.normal(kx, (N, C, H, W), dtype=jnp.float32)

    # Deterministic fixed filter `f` (Sobel-style horizontal gradient,
    # replicated over input channels), shape (1, C, 3, 3).
    sobel = jnp.array([[-1.0, 0.0, 1.0],
                       [-2.0, 0.0, 2.0],
                       [-1.0, 0.0, 1.0]], dtype=jnp.float32) / float(C)
    f = jnp.broadcast_to(sobel, (1, C, 3, 3))

    # Match the PyTorch module: BOTH Gh.weight and Gv.weight are set to `f`.
    w_h = f
    w_v = f
    b_h = jax.random.uniform(kb1, (), minval=-0.1, maxval=0.1, dtype=jnp.float32)
    b_v = jax.random.uniform(kb2, (), minval=-0.1, maxval=0.1, dtype=jnp.float32)

    out = gcb_forward(x, w_h, w_v, b_h, b_v)
    out = jax.block_until_ready(out)
    ref = _reference(x, w_h, w_v, b_h, b_v)
    assert out.shape == (N, 1, H, W)
    assert jnp.allclose(out, ref, atol=1e-5, rtol=1e-5), "mismatch (shared path)"

    # ---- secondary check: general two-weight path, fori channel loop (C > 8),
    #      and multi-strip accumulation (strip_rows=8) ----
    N2, C2, H2, W2 = 1, 12, 16, 16
    x2 = jax.random.normal(kx2, (N2, C2, H2, W2), dtype=jnp.float32)
    w_h2 = jax.random.normal(kw2a, (1, C2, 3, 3), dtype=jnp.float32) * 0.1
    w_v2 = jax.random.normal(kw2b, (1, C2, 3, 3), dtype=jnp.float32) * 0.1
    b_h2 = jax.random.uniform(kb3, (), minval=-0.1, maxval=0.1, dtype=jnp.float32)
    b_v2 = jax.random.uniform(kb4, (), minval=-0.1, maxval=0.1, dtype=jnp.float32)

    out2 = gcb_forward(x2, w_h2, w_v2, b_h2, b_v2, strip_rows=8)
    out2 = jax.block_until_ready(out2)
    ref2 = _reference(x2, w_h2, w_v2, b_h2, b_v2)
    assert jnp.allclose(out2, ref2, atol=1e-4, rtol=1e-4), "mismatch (general path)"

    print("KERNEL_OK")
</pallas_src>

<mosaic_0001>
module attributes {stable_mosaic.version = 11 : i64} {
  func.func @kernel(%arg0: i32, %arg1: memref<1x4x16x16xf32, #tpu.memory_space<vmem>>, %arg2: memref<36xf32, #tpu.memory_space<smem>>, %arg3: memref<36xf32, #tpu.memory_space<smem>>, %arg4: memref<2xf32, #tpu.memory_space<smem>>, %arg5: memref<1x1x16x16xf32, #tpu.memory_space<vmem>>, %arg6: memref<1x4x18x18xf32, #tpu.memory_space<vmem>>) attributes {dimension_semantics = [#tpu.dimension_semantics<parallel>], iteration_bounds = array<i64: 2>, scalar_prefetch = 0 : i64, scratch_operands = 1 : i64, tpu.core_type = #tpu.core_type<tc>, window_params = [{transform_indices = @transform_0, window_bounds = array<i64: 1, 4, 16, 16>}, {transform_indices = @transform_1, window_bounds = array<i64: 36>}, {transform_indices = @transform_2, window_bounds = array<i64: 36>}, {transform_indices = @transform_3, window_bounds = array<i64: 2>}, {transform_indices = @transform_4, window_bounds = array<i64: 1, 1, 16, 16>}]} {
    %cst = arith.constant 0.000000e+00 : f32
    %0 = vector.broadcast %cst : f32 to vector<1x4x18x18xf32>
    %c0 = arith.constant 0 : index
    %c0_0 = arith.constant 0 : index
    %c0_1 = arith.constant 0 : index
    %c0_2 = arith.constant 0 : index
    %1 = vector.load %arg6[%c0, %c0_0, %c0_1, %c0_2] : memref<1x4x18x18xf32, #tpu.memory_space<vmem>>, vector<1x4x18x18xf32>
    tpu.vector_store %arg6[%c0, %c0_0, %c0_1, %c0_2], %0 {strides = array<i32>} : memref<1x4x18x18xf32, #tpu.memory_space<vmem>>, vector<1x4x18x18xf32>,
    %c0_3 = arith.constant 0 : index
    %c0_4 = arith.constant 0 : index
    %c0_5 = arith.constant 0 : index
    %c0_6 = arith.constant 0 : index
    %2 = vector.load %arg1[%c0_3, %c0_4, %c0_5, %c0_6] : memref<1x4x16x16xf32, #tpu.memory_space<vmem>>, vector<1x4x16x16xf32>
    %c0_7 = arith.constant 0 : index
    %c0_8 = arith.constant 0 : index
    %c1 = arith.constant 1 : index
    %c1_9 = arith.constant 1 : index
    %3 = vector.load %arg6[%c0_7, %c0_8, %c1, %c1_9] : memref<1x4x18x18xf32, #tpu.memory_space<vmem>>, vector<1x4x16x16xf32>
    tpu.vector_store %arg6[%c0_7, %c0_8, %c1, %c1_9], %2 {strides = array<i32>} : memref<1x4x18x18xf32, #tpu.memory_space<vmem>>, vector<1x4x16x16xf32>,
    %c0_10 = arith.constant 0 : index
    %4 = memref.load %arg4[%c0_10] : memref<2xf32, #tpu.memory_space<smem>>
    %c1_11 = arith.constant 1 : index
    %5 = memref.load %arg4[%c1_11] : memref<2xf32, #tpu.memory_space<smem>>
    %cst_12 = arith.constant 0.000000e+00 : f32
    %6 = vector.broadcast %cst_12 : f32 to vector<16x16xf32>
    %c0_13 = arith.constant 0 : index
    %c0_14 = arith.constant 0 : index
    %c0_15 = arith.constant 0 : index
    %c0_16 = arith.constant 0 : index
    %7 = vector.load %arg6[%c0_13, %c0_14, %c0_15, %c0_16] : memref<1x4x18x18xf32, #tpu.memory_space<vmem>>, vector<1x1x18x18xf32>
    %8 = vector.shape_cast %7 : vector<1x1x18x18xf32> to vector<18x18xf32>
    %9 = vector.extract_strided_slice %8 {offsets = [0, 0], sizes = [16, 18], strides = [1, 1]} : vector<18x18xf32> to vector<16x18xf32>
    %10 = vector.extract_strided_slice %9 {offsets = [0, 0], sizes = [16, 16], strides = [1, 1]} : vector<16x18xf32> to vector<16x16xf32>
    %c0_17 = arith.constant 0 : index
    %11 = memref.load %arg2[%c0_17] : memref<36xf32, #tpu.memory_space<smem>>
    %12 = vector.broadcast %11 : f32 to vector<16x16xf32>
    %13 = arith.mulf %10, %12 : vector<16x16xf32>
    %14 = arith.addf %6, %13 : vector<16x16xf32>
    %15 = vector.extract_strided_slice %9 {offsets = [0, 1], sizes = [16, 16], strides = [1, 1]} : vector<16x18xf32> to vector<16x16xf32>
    %c1_18 = arith.constant 1 : index
    %16 = memref.load %arg2[%c1_18] : memref<36xf32, #tpu.memory_space<smem>>
    %17 = vector.broadcast %16 : f32 to vector<16x16xf32>
    %18 = arith.mulf %15, %17 : vector<16x16xf32>
    %19 = arith.addf %14, %18 : vector<16x16xf32>
    %20 = vector.extract_strided_slice %9 {offsets = [0, 2], sizes = [16, 16], strides = [1, 1]} : vector<16x18xf32> to vector<16x16xf32>
    %c2 = arith.constant 2 : index
    %21 = memref.load %arg2[%c2] : memref<36xf32, #tpu.memory_space<smem>>
    %22 = vector.broadcast %21 : f32 to vector<16x16xf32>
    %23 = arith.mulf %20, %22 : vector<16x16xf32>
    %24 = arith.addf %19, %23 : vector<16x16xf32>
    %25 = vector.extract_strided_slice %8 {offsets = [1, 0], sizes = [16, 18], strides = [1, 1]} : vector<18x18xf32> to vector<16x18xf32>
    %26 = vector.extract_strided_slice %25 {offsets = [0, 0], sizes = [16, 16], strides = [1, 1]} : vector<16x18xf32> to vector<16x16xf32>
    %c3 = arith.constant 3 : index
    %27 = memref.load %arg2[%c3] : memref<36xf32, #tpu.memory_space<smem>>
    %28 = vector.broadcast %27 : f32 to vector<16x16xf32>
    %29 = arith.mulf %26, %28 : vector<16x16xf32>
    %30 = arith.addf %24, %29 : vector<16x16xf32>
    %31 = vector.extract_strided_slice %25 {offsets = [0, 1], sizes = [16, 16], strides = [1, 1]} : vector<16x18xf32> to vector<16x16xf32>
    %c4 = arith.constant 4 : index
    %32 = memref.load %arg2[%c4] : memref<36xf32, #tpu.memory_space<smem>>
    %33 = vector.broadcast %32 : f32 to vector<16x16xf32>
    %34 = arith.mulf %31, %33 : vector<16x16xf32>
    %35 = arith.addf %30, %34 : vector<16x16xf32>
    %36 = vector.extract_strided_slice %25 {offsets = [0, 2], sizes = [16, 16], strides = [1, 1]} : vector<16x18xf32> to vector<16x16xf32>
    %c5 = arith.constant 5 : index
    %37 = memref.load %arg2[%c5] : memref<36xf32, #tpu.memory_space<smem>>
    %38 = vector.broadcast %37 : f32 to vector<16x16xf32>
    %39 = arith.mulf %36, %38 : vector<16x16xf32>
    %40 = arith.addf %35, %39 : vector<16x16xf32>
    %41 = vector.extract_strided_slice %8 {offsets = [2, 0], sizes = [16, 18], strides = [1, 1]} : vector<18x18xf32> to vector<16x18xf32>
    %42 = vector.extract_strided_slice %41 {offsets = [0, 0], sizes = [16, 16], strides = [1, 1]} : vector<16x18xf32> to vector<16x16xf32>
    %c6 = arith.constant 6 : index
    %43 = memref.load %arg2[%c6] : memref<36xf32, #tpu.memory_space<smem>>
    %44 = vector.broadcast %43 : f32 to vector<16x16xf32>
    %45 = arith.mulf %42, %44 : vector<16x16xf32>
    %46 = arith.addf %40, %45 : vector<16x16xf32>
    %47 = vector.extract_strided_slice %41 {offsets = [0, 1], sizes = [16, 16], strides = [1, 1]} : vector<16x18xf32> to vector<16x16xf32>
    %c7 = arith.constant 7 : index
    %48 = memref.load %arg2[%c7] : memref<36xf32, #tpu.memory_space<smem>>
    %49 = vector.broadcast %48 : f32 to vector<16x16xf32>
    %50 = arith.mulf %47, %49 : vector<16x16xf32>
    %51 = arith.addf %46, %50 : vector<16x16xf32>
    %52 = vector.extract_strided_slice %41 {offsets = [0, 2], sizes = [16, 16], strides = [1, 1]} : vector<16x18xf32> to vector<16x16xf32>
    %c8 = arith.constant 8 : index
    %53 = memref.load %arg2[%c8] : memref<36xf32, #tpu.memory_space<smem>>
    %54 = vector.broadcast %53 : f32 to vector<16x16xf32>
    %55 = arith.mulf %52, %54 : vector<16x16xf32>
    %56 = arith.addf %51, %55 : vector<16x16xf32>
    %c0_19 = arith.constant 0 : index
    %c1_20 = arith.constant 1 : index
    %c0_21 = arith.constant 0 : index
    %c0_22 = arith.constant 0 : index
    %57 = vector.load %arg6[%c0_19, %c1_20, %c0_21, %c0_22] : memref<1x4x18x18xf32, #tpu.memory_space<vmem>>, vector<1x1x18x18xf32>
    %58 = vector.shape_cast %57 : vector<1x1x18x18xf32> to vector<18x18xf32>
    %59 = vector.extract_strided_slice %58 {offsets = [0, 0], sizes = [16, 18], strides = [1, 1]} : vector<18x18xf32> to vector<16x18xf32>
    %60 = vector.extract_strided_slice %59 {offsets = [0, 0], sizes = [16, 16], strides = [1, 1]} : vector<16x18xf32> to vector<16x16xf32>
    %c9 = arith.constant 9 : index
    %61 = memref.load %arg2[%c9] : memref<36xf32, #tpu.memory_space<smem>>
    %62 = vector.broadcast %61 : f32 to vector<16x16xf32>
    %63 = arith.mulf %60, %62 : vector<16x16xf32>
    %64 = arith.addf %56, %63 : vector<16x16xf32>
    %65 = vector.extract_strided_slice %59 {offsets = [0, 1], sizes = [16, 16], strides = [1, 1]} : vector<16x18xf32> to vector<16x16xf32>
    %c10 = arith.constant 10 : index
    %66 = memref.load %arg2[%c10] : memref<36xf32, #tpu.memory_space<smem>>
    %67 = vector.broadcast %66 : f32 to vector<16x16xf32>
    %68 = arith.mulf %65, %67 : vector<16x16xf32>
    %69 = arith.addf %64, %68 : vector<16x16xf32>
    %70 = vector.extract_strided_slice %59 {offsets = [0, 2], sizes = [16, 16], strides = [1, 1]} : vector<16x18xf32> to vector<16x16xf32>
    %c11 = arith.constant 11 : index
    %71 = memref.load %arg2[%c11] : memref<36xf32, #tpu.memory_space<smem>>
    %72 = vector.broadcast %71 : f32 to vector<16x16xf32>
    %73 = arith.mulf %70, %72 : vector<16x16xf32>
    %74 = arith.addf %69, %73 : vector<16x16xf32>
    %75 = vector.extract_strided_slice %58 {offsets = [1, 0], sizes = [16, 18], strides = [1, 1]} : vector<18x18xf32> to vector<16x18xf32>
    %76 = vector.extract_strided_slice %75 {offsets = [0, 0], sizes = [16, 16], strides = [1, 1]} : vector<16x18xf32> to vector<16x16xf32>
    %c12 = arith.constant 12 : index
    %77 = memref.load %arg2[%c12] : memref<36xf32, #tpu.memory_space<smem>>
    %78 = vector.broadcast %77 : f32 to vector<16x16xf32>
    %79 = arith.mulf %76, %78 : vector<16x16xf32>
    %80 = arith.addf %74, %79 : vector<16x16xf32>
    %81 = vector.extract_strided_slice %75 {offsets = [0, 1], sizes = [16, 16], strides = [1, 1]} : vector<16x18xf32> to vector<16x16xf32>
    %c13 = arith.constant 13 : index
    %82 = memref.load %arg2[%c13] : memref<36xf32, #tpu.memory_space<smem>>
    %83 = vector.broadcast %82 : f32 to vector<16x16xf32>
    %84 = arith.mulf %81, %83 : vector<16x16xf32>
    %85 = arith.addf %80, %84 : vector<16x16xf32>
    %86 = vector.extract_strided_slice %75 {offsets = [0, 2], sizes = [16, 16], strides = [1, 1]} : vector<16x18xf32> to vector<16x16xf32>
    %c14 = arith.constant 14 : index
    %87 = memref.load %arg2[%c14] : memref<36xf32, #tpu.memory_space<smem>>
    %88 = vector.broadcast %87 : f32 to vector<16x16xf32>
    %89 = arith.mulf %86, %88 : vector<16x16xf32>
    %90 = arith.addf %85, %89 : vector<16x16xf32>
    %91 = vector.extract_strided_slice %58 {offsets = [2, 0], sizes = [16, 18], strides = [1, 1]} : vector<18x18xf32> to vector<16x18xf32>
    %92 = vector.extract_strided_slice %91 {offsets = [0, 0], sizes = [16, 16], strides = [1, 1]} : vector<16x18xf32> to vector<16x16xf32>
    %c15 = arith.constant 15 : index
    %93 = memref.load %arg2[%c15] : memref<36xf32, #tpu.memory_space<smem>>
    %94 = vector.broadcast %93 : f32 to vector<16x16xf32>
    %95 = arith.mulf %92, %94 : vector<16x16xf32>
    %96 = arith.addf %90, %95 : vector<16x16xf32>
    %97 = vector.extract_strided_slice %91 {offsets = [0, 1], sizes = [16, 16], strides = [1, 1]} : vector<16x18xf32> to vector<16x16xf32>
    %c16 = arith.constant 16 : index
    %98 = memref.load %arg2[%c16] : memref<36xf32, #tpu.memory_space<smem>>
    %99 = vector.broadcast %98 : f32 to vector<16x16xf32>
    %100 = arith.mulf %97, %99 : vector<16x16xf32>
    %101 = arith.addf %96, %100 : vector<16x16xf32>
    %102 = vector.extract_strided_slice %91 {offsets = [0, 2], sizes = [16, 16], strides = [1, 1]} : vector<16x18xf32> to vector<16x16xf32>
    %c17 = arith.constant 17 : index
    %103 = memref.load %arg2[%c17] : memref<36xf32, #tpu.memory_space<smem>>
    %104 = vector.broadcast %103 : f32 to vector<16x16xf32>
    %105 = arith.mulf %102, %104 : vector<16x16xf32>
    %106 = arith.addf %101, %105 : vector<16x16xf32>
    %c0_23 = arith.constant 0 : index
    %c2_24 = arith.constant 2 : index
    %c0_25 = arith.constant 0 : index
    %c0_26 = arith.constant 0 : index
    %107 = vector.load %arg6[%c0_23, %c2_24, %c0_25, %c0_26] : memref<1x4x18x18xf32, #tpu.memory_space<vmem>>, vector<1x1x18x18xf32>
    %108 = vector.shape_cast %107 : vector<1x1x18x18xf32> to vector<18x18xf32>
    %109 = vector.extract_strided_slice %108 {offsets = [0, 0], sizes = [16, 18], strides = [1, 1]} : vector<18x18xf32> to vector<16x18xf32>
    %110 = vector.extract_strided_slice %109 {offsets = [0, 0], sizes = [16, 16], strides = [1, 1]} : vector<16x18xf32> to vector<16x16xf32>
    %c18 = arith.constant 18 : index
    %111 = memref.load %arg2[%c18] : memref<36xf32, #tpu.memory_space<smem>>
    %112 = vector.broadcast %111 : f32 to vector<16x16xf32>
    %113 = arith.mulf %110, %112 : vector<16x16xf32>
    %114 = arith.addf %106, %113 : vector<16x16xf32>
    %115 = vector.extract_strided_slice %109 {offsets = [0, 1], sizes = [16, 16], strides = [1, 1]} : vector<16x18xf32> to vector<16x16xf32>
    %c19 = arith.constant 19 : index
    %116 = memref.load %arg2[%c19] : memref<36xf32, #tpu.memory_space<smem>>
    %117 = vector.broadcast %116 : f32 to vector<16x16xf32>
    %118 = arith.mulf %115, %117 : vector<16x16xf32>
    %119 = arith.addf %114, %118 : vector<16x16xf32>
    %120 = vector.extract_strided_slice %109 {offsets = [0, 2], sizes = [16, 16], strides = [1, 1]} : vector<16x18xf32> to vector<16x16xf32>
    %c20 = arith.constant 20 : index
    %121 = memref.load %arg2[%c20] : memref<36xf32, #tpu.memory_space<smem>>
    %122 = vector.broadcast %121 : f32 to vector<16x16xf32>
    %123 = arith.mulf %120, %122 : vector<16x16xf32>
    %124 = arith.addf %119, %123 : vector<16x16xf32>
    %125 = vector.extract_strided_slice %108 {offsets = [1, 0], sizes = [16, 18], strides = [1, 1]} : vector<18x18xf32> to vector<16x18xf32>
    %126 = vector.extract_strided_slice %125 {offsets = [0, 0], sizes = [16, 16], strides = [1, 1]} : vector<16x18xf32> to vector<16x16xf32>
    %c21 = arith.constant 21 : index
    %127 = memref.load %arg2[%c21] : memref<36xf32, #tpu.memory_space<smem>>
    %128 = vector.broadcast %127 : f32 to vector<16x16xf32>
    %129 = arith.mulf %126, %128 : vector<16x16xf32>
    %130 = arith.addf %124, %129 : vector<16x16xf32>
    %131 = vector.extract_strided_slice %125 {offsets = [0, 1], sizes = [16, 16], strides = [1, 1]} : vector<16x18xf32> to vector<16x16xf32>
    %c22 = arith.constant 22 : index
    %132 = memref.load %arg2[%c22] : memref<36xf32, #tpu.memory_space<smem>>
    %133 = vector.broadcast %132 : f32 to vector<16x16xf32>
    %134 = arith.mulf %131, %133 : vector<16x16xf32>
    %135 = arith.addf %130, %134 : vector<16x16xf32>
    %136 = vector.extract_strided_slice %125 {offsets = [0, 2], sizes = [16, 16], strides = [1, 1]} : vector<16x18xf32> to vector<16x16xf32>
    %c23 = arith.constant 23 : index
    %137 = memref.load %arg2[%c23] : memref<36xf32, #tpu.memory_space<smem>>
    %138 = vector.broadcast %137 : f32 to vector<16x16xf32>
    %139 = arith.mulf %136, %138 : vector<16x16xf32>
    %140 = arith.addf %135, %139 : vector<16x16xf32>
    %141 = vector.extract_strided_slice %108 {offsets = [2, 0], sizes = [16, 18], strides = [1, 1]} : vector<18x18xf32> to vector<16x18xf32>
    %142 = vector.extract_strided_slice %141 {offsets = [0, 0], sizes = [16, 16], strides = [1, 1]} : vector<16x18xf32> to vector<16x16xf32>
    %c24 = arith.constant 24 : index
    %143 = memref.load %arg2[%c24] : memref<36xf32, #tpu.memory_space<smem>>
    %144 = vector.broadcast %143 : f32 to vector<16x16xf32>
    %145 = arith.mulf %142, %144 : vector<16x16xf32>
    %146 = arith.addf %140, %145 : vector<16x16xf32>
    %147 = vector.extract_strided_slice %141 {offsets = [0, 1], sizes = [16, 16], strides = [1, 1]} : vector<16x18xf32> to vector<16x16xf32>
    %c25 = arith.constant 25 : index
    %148 = memref.load %arg2[%c25] : memref<36xf32, #tpu.memory_space<smem>>
    %149 = vector.broadcast %148 : f32 to vector<16x16xf32>
    %150 = arith.mulf %147, %149 : vector<16x16xf32>
    %151 = arith.addf %146, %150 : vector<16x16xf32>
    %152 = vector.extract_strided_slice %141 {offsets = [0, 2], sizes = [16, 16], strides = [1, 1]} : vector<16x18xf32> to vector<16x16xf32>
    %c26 = arith.constant 26 : index
    %153 = memref.load %arg2[%c26] : memref<36xf32, #tpu.memory_space<smem>>
    %154 = vector.broadcast %153 : f32 to vector<16x16xf32>
    %155 = arith.mulf %152, %154 : vector<16x16xf32>
    %156 = arith.addf %151, %155 : vector<16x16xf32>
    %c0_27 = arith.constant 0 : index
    %c3_28 = arith.constant 3 : index
    %c0_29 = arith.constant 0 : index
    %c0_30 = arith.constant 0 : index
    %157 = vector.load %arg6[%c0_27, %c3_28, %c0_29, %c0_30] : memref<1x4x18x18xf32, #tpu.memory_space<vmem>>, vector<1x1x18x18xf32>
    %158 = vector.shape_cast %157 : vector<1x1x18x18xf32> to vector<18x18xf32>
    %159 = vector.extract_strided_slice %158 {offsets = [0, 0], sizes = [16, 18], strides = [1, 1]} : vector<18x18xf32> to vector<16x18xf32>
    %160 = vector.extract_strided_slice %159 {offsets = [0, 0], sizes = [16, 16], strides = [1, 1]} : vector<16x18xf32> to vector<16x16xf32>
    %c27 = arith.constant 27 : index
    %161 = memref.load %arg2[%c27] : memref<36xf32, #tpu.memory_space<smem>>
    %162 = vector.broadcast %161 : f32 to vector<16x16xf32>
    %163 = arith.mulf %160, %162 : vector<16x16xf32>
    %164 = arith.addf %156, %163 : vector<16x16xf32>
    %165 = vector.extract_strided_slice %159 {offsets = [0, 1], sizes = [16, 16], strides = [1, 1]} : vector<16x18xf32> to vector<16x16xf32>
    %c28 = arith.constant 28 : index
    %166 = memref.load %arg2[%c28] : memref<36xf32, #tpu.memory_space<smem>>
    %167 = vector.broadcast %166 : f32 to vector<16x16xf32>
    %168 = arith.mulf %165, %167 : vector<16x16xf32>
    %169 = arith.addf %164, %168 : vector<16x16xf32>
    %170 = vector.extract_strided_slice %159 {offsets = [0, 2], sizes = [16, 16], strides = [1, 1]} : vector<16x18xf32> to vector<16x16xf32>
    %c29 = arith.constant 29 : index
    %171 = memref.load %arg2[%c29] : memref<36xf32, #tpu.memory_space<smem>>
    %172 = vector.broadcast %171 : f32 to vector<16x16xf32>
    %173 = arith.mulf %170, %172 : vector<16x16xf32>
    %174 = arith.addf %169, %173 : vector<16x16xf32>
    %175 = vector.extract_strided_slice %158 {offsets = [1, 0], sizes = [16, 18], strides = [1, 1]} : vector<18x18xf32> to vector<16x18xf32>
    %176 = vector.extract_strided_slice %175 {offsets = [0, 0], sizes = [16, 16], strides = [1, 1]} : vector<16x18xf32> to vector<16x16xf32>
    %c30 = arith.constant 30 : index
    %177 = memref.load %arg2[%c30] : memref<36xf32, #tpu.memory_space<smem>>
    %178 = vector.broadcast %177 : f32 to vector<16x16xf32>
    %179 = arith.mulf %176, %178 : vector<16x16xf32>
    %180 = arith.addf %174, %179 : vector<16x16xf32>
    %181 = vector.extract_strided_slice %175 {offsets = [0, 1], sizes = [16, 16], strides = [1, 1]} : vector<16x18xf32> to vector<16x16xf32>
    %c31 = arith.constant 31 : index
    %182 = memref.load %arg2[%c31] : memref<36xf32, #tpu.memory_space<smem>>
    %183 = vector.broadcast %182 : f32 to vector<16x16xf32>
    %184 = arith.mulf %181, %183 : vector<16x16xf32>
    %185 = arith.addf %180, %184 : vector<16x16xf32>
    %186 = vector.extract_strided_slice %175 {offsets = [0, 2], sizes = [16, 16], strides = [1, 1]} : vector<16x18xf32> to vector<16x16xf32>
    %c32 = arith.constant 32 : index
    %187 = memref.load %arg2[%c32] : memref<36xf32, #tpu.memory_space<smem>>
    %188 = vector.broadcast %187 : f32 to vector<16x16xf32>
    %189 = arith.mulf %186, %188 : vector<16x16xf32>
    %190 = arith.addf %185, %189 : vector<16x16xf32>
    %191 = vector.extract_strided_slice %158 {offsets = [2, 0], sizes = [16, 18], strides = [1, 1]} : vector<18x18xf32> to vector<16x18xf32>
    %192 = vector.extract_strided_slice %191 {offsets = [0, 0], sizes = [16, 16], strides = [1, 1]} : vector<16x18xf32> to vector<16x16xf32>
    %c33 = arith.constant 33 : index
    %193 = memref.load %arg2[%c33] : memref<36xf32, #tpu.memory_space<smem>>
    %194 = vector.broadcast %193 : f32 to vector<16x16xf32>
    %195 = arith.mulf %192, %194 : vector<16x16xf32>
    %196 = arith.addf %190, %195 : vector<16x16xf32>
    %197 = vector.extract_strided_slice %191 {offsets = [0, 1], sizes = [16, 16], strides = [1, 1]} : vector<16x18xf32> to vector<16x16xf32>
    %c34 = arith.constant 34 : index
    %198 = memref.load %arg2[%c34] : memref<36xf32, #tpu.memory_space<smem>>
    %199 = vector.broadcast %198 : f32 to vector<16x16xf32>
    %200 = arith.mulf %197, %199 : vector<16x16xf32>
    %201 = arith.addf %196, %200 : vector<16x16xf32>
    %202 = vector.extract_strided_slice %191 {offsets = [0, 2], sizes = [16, 16], strides = [1, 1]} : vector<16x18xf32> to vector<16x16xf32>
    %c35 = arith.constant 35 : index
    %203 = memref.load %arg2[%c35] : memref<36xf32, #tpu.memory_space<smem>>
    %204 = vector.broadcast %203 : f32 to vector<16x16xf32>
    %205 = arith.mulf %202, %204 : vector<16x16xf32>
    %206 = arith.addf %201, %205 : vector<16x16xf32>
    %207 = vector.broadcast %4 : f32 to vector<16x16xf32>
    %208 = arith.addf %206, %207 : vector<16x16xf32>
    %209 = vector.broadcast %5 : f32 to vector<16x16xf32>
    %210 = arith.addf %206, %209 : vector<16x16xf32>
    %211 = arith.mulf %208, %208 : vector<16x16xf32>
    %212 = arith.mulf %210, %210 : vector<16x16xf32>
    %213 = arith.addf %211, %212 : vector<16x16xf32>
    %214 = math.sqrt %213 : vector<16x16xf32>
    %c0_31 = arith.constant 0 : index
    %c0_32 = arith.constant 0 : index
    %c0_33 = arith.constant 0 : index
    %c0_34 = arith.constant 0 : index
    %215 = vector.load %arg5[%c0_31, %c0_32, %c0_33, %c0_34] : memref<1x1x16x16xf32, #tpu.memory_space<vmem>>, vector<1x1x16x16xf32>
    %216 = vector.shape_cast %215 : vector<1x1x16x16xf32> to vector<16x16xf32>
    %217 = vector.shape_cast %214 : vector<16x16xf32> to vector<1x1x16x16xf32>
    tpu.vector_store %arg5[%c0_31, %c0_32, %c0_33, %c0_34], %217 {strides = array<i32>} : memref<1x1x16x16xf32, #tpu.memory_space<vmem>>, vector<1x1x16x16xf32>,
    return
  }
  func.func @transform_0(%arg0: i32) -> (i32, i32, i32, i32) {
    %c0_i32 = arith.constant 0 : i32
    %c0_i32_0 = arith.constant 0 : i32
    %c0_i32_1 = arith.constant 0 : i32
    %c0_i32_2 = arith.constant 0 : i32
    return %arg0, %c0_i32, %c0_i32_0, %c0_i32_1 : i32, i32, i32, i32
  }
  func.func @transform_1(%arg0: i32) -> i32 {
    %c0_i32 = arith.constant 0 : i32
    %c0_i32_0 = arith.constant 0 : i32
    return %c0_i32 : i32
  }
  func.func @transform_2(%arg0: i32) -> i32 {
    %c0_i32 = arith.constant 0 : i32
    %c0_i32_0 = arith.constant 0 : i32
    return %c0_i32 : i32
  }
  func.func @transform_3(%arg0: i32) -> i32 {
    %c0_i32 = arith.constant 0 : i32
    %c0_i32_0 = arith.constant 0 : i32
    return %c0_i32 : i32
  }
  func.func @transform_4(%arg0: i32) -> (i32, i32, i32, i32) {
    %c0_i32 = arith.constant 0 : i32
    %c0_i32_0 = arith.constant 0 : i32
    %c0_i32_1 = arith.constant 0 : i32
    %c0_i32_2 = arith.constant 0 : i32
    return %arg0, %c0_i32, %c0_i32_0, %c0_i32_1 : i32, i32, i32, i32
  }
}

</mosaic_0001>

<bundles_post_ra>
// kernel: tpu_custom_call.1
= control target key start
LH: loop header
LB: loop body
LE: loop exit
PB: predicated region body
PF: predicated region fallthrough
CT: control target
= control target key end

     0   :  { %s2122_s0 = inlined_call_operand.hbm [shape: f32[2,4,16,16], index: 0, kind: input, shape index: {}]   ;;  %s2123_s1 = inlined_call_operand.vmem [shape: f32[36], index: 1, kind: input, shape index: {}]   ;;  %s2124_s2 = inlined_call_operand.vmem [shape: f32[36], index: 2, kind: input, shape index: {}]   ;;  %s2125_s3 = inlined_call_operand.vmem [shape: f32[2], index: 3, kind: input, shape index: {}]   ;;  %s2126_s4 = inlined_call_operand.hbm [shape: f32[2,1,16,16], index: 4, kind: output, shape index: {}]  }
   0x1   :  { %2134 = sst [smem:[#allocation17_spill]] %s2122_s0 }
   0x2   :  { %2135 = sst [smem:[#allocation18_spill]] %s2123_s1 }
   0x3   :  { %2136 = sst [smem:[#allocation19_spill]] %s2124_s2 }
   0x4   :  { %2137 = sst [smem:[#allocation20_spill]] %s2125_s3 }
   0x5   :  { %9 = vsyncpa [#allocation4], 0 }
   0x6   :  { %11 = vsyncpa [#allocation4 + $0x1], 0 }
   0x7   :  { %12 = vsyncpa [#allocation6], 0 }
   0x8   :  { %13 = vsyncpa [#allocation9], 0 }
   0x9   :  { %14 = vsyncpa [#allocation5], 0 }
   0xa   :  { %16 = vsyncpa [#allocation5 + $0x1], 0  ;;  %s1428_s15 = smov 0   ;;  %s1430_s16 = smov 0  }
   0xb   :  { %s1432_s17 = smov 0   ;;  %s1434_s18 = smov 0  }
   0xc LB: > { %s1449_s19 = sadd.s32 4294967295, %s1388_s18   ;;  %s1092_s20 = sadd.s32 4294967294, %s1388_s18   ;;  %s1388_s18 = sphi %s1434_s18, %s2164_s18   ;;  %s1384_s17 = sphi %s1432_s17, %s2163_s17   ;;  %s1380_s16 = sphi %s1430_s16, %s2162_s16   ;;  %s1376_s15 = sphi %s1428_s15, %s2161_s15  }
   0xd   : > { %p42_p0 = scmp.ne.s32.totalorder %s1380_s16, %s1376_s15  ;;  %p2127_p1 = scmp.eq.s32.totalorder %s1449_s19, 0 }
   0xe   : > { %p135_p3 = scmp.eq.s32.totalorder %s1092_s20, 1  ;;  %p1093_p5 = scmp.ge.s32.totalorder %s1388_s18, 1 }
   0xf   : > { %p1458_p4 = por %p2127_p1, %p42_p0  ;;  %p142_p7 = scmp.lt.s32.totalorder %s1388_s18, 3 }
  0x10   : > { %p1463_p6 = por %p135_p3, %p42_p0  ;;  %s2140_s2 = sld [smem:[#allocation19_spill]] }
  0x11   : > { %s2138_s21 = scalar_select %p1458_p4, 1, 0 }
  0x12   : > { %s2139_s22 = scalar_select %p1463_p6, 1, 0 }
  0x13   : > { %p1471_p8 = pnand %p1093_p5, %p142_p7  ;;  %s2142_s1 = sld [smem:[#allocation18_spill]] }
  0x14   : > { %s2144_s3 = sld [smem:[#allocation20_spill]] }
  0x15   : > { %s2141_s26 = scalar_select %p1471_p8, 1, 0 }
  0x16   : > { %s166_s25 = sshll.u32 %s2140_s2, 4  ;;  %p1166_p10 = pneg %p1471_p8  ;;  %s167_s25 = int_to_ptr.vmem [resolvable:$true] %s166_s25 }
  0x17   : > { %s1239_s8 = scalar_lea.vmem %s167_s25, 16  ;;  %p1247_p5 = scmp.lt.s32.totalorder %s167_s25, %s167_s25 }
  0x18   : > { %p1483_p11 = pnand %p1166_p10, %p2127_p1  ;;  %p1240_p12 = scmp.ne.s32.totalorder %s167_s25, %s1239_s8 }
  0x19   : > { %s155_s29 = sshll.u32 %s2142_s1, 4  ;;  %p1248_p7 = scmp.lt.s32.totalorder %s1239_s8, %s1239_s8  ;;  %s156_s29 = int_to_ptr.vmem [resolvable:$true] %s155_s29 }
  0x1a   : > { %s177_s7 = sshll.u32 %s2144_s3, 4  ;;  %p1241_p13 = pneg %p1483_p11  ;;  %s1490_s7 = int_to_ptr.vmem [resolvable:$true] %s177_s7 }
  0x1b   : > { %p1249_p10 = por %p1248_p7, %p1247_p5 }
  0x1c   : > { %p1242_p0 = pnand %p1241_p13, %p1240_p12 }
  0x1e   : > { %p1243_p3 = pneg %p1242_p0 }
  0x20   : > { %p1250_p9 = pnand %p1249_p10, %p1243_p3 }
  0x22   : > { %1253 = shalt.err (!%p1250_p9)
}
  0x23   : > { %s1390_s9 = smov [#allocation8]   ;;  %s1254_s10 = scalar_lea.vmem %s156_s29, 16 }
  0x24   : > { %1172 = dma.vmem_to_smem (!%p1483_p11), %s167_s25, 16, %s1390_s9, [#allocation9]  }
  0x25   : > { %p1255_p1 = scmp.ne.s32.totalorder %s156_s29, %s1254_s10  ;;  %p1262_p4 = scmp.lt.s32.totalorder %s156_s29, %s156_s29 }
  0x26   : > { %p1263_p8 = scmp.lt.s32.totalorder %s1254_s10, %s1254_s10 }
  0x27   : > { %p1257_p2 = pnand %p1255_p1, %p1241_p13 }
  0x28   : > { %p1264_p12 = por %p1263_p8, %p1262_p4 }
  0x29   : > { %p1258_p6 = pneg %p1257_p2 }
  0x2b   : > { %p1265_p0 = pnand %p1264_p12, %p1258_p6 }
  0x2d   : > { %1268 = shalt.err (!%p1265_p0)
}
  0x2e   : > { %s1391_s11 = smov [#allocation7]   ;;  %s1269_s12 = scalar_lea.vmem %s1490_s7, 16 }
  0x2f   : > { %1169 = dma.vmem_to_smem (!%p1483_p11), %s156_s29, 16, %s1391_s11, [#allocation6]  }
  0x30   : > { %p1270_p9 = scmp.ne.s32.totalorder %s1490_s7, %s1269_s12  ;;  %p1277_p2 = scmp.lt.s32.totalorder %s1490_s7, %s1490_s7 }
  0x31   : > { %p1278_p5 = scmp.lt.s32.totalorder %s1269_s12, %s1269_s12 }
  0x32   : > { %p1272_p3 = pnand %p1270_p9, %p1241_p13 }
  0x33   : > { %p1279_p4 = por %p1278_p5, %p1277_p2 }
  0x34   : > { %p1273_p1 = pneg %p1272_p3 }
  0x36   : > { %p1280_p6 = pnand %p1279_p4, %p1273_p1 }
  0x38   : > { %1283 = shalt.err (!%p1280_p6)
}
  0x39   : > { %s1392_s13 = smov [#allocation10]   ;;  %s1515_s14 = sadd.s32 1, %s1388_s18  }
  0x3a   : > { %1175 = dma.vmem_to_smem (!%p1483_p11), %s1490_s7, 16, %s1392_s13, [#allocation9]  }
  0x3b   : > { %s26_s20 = ssub.s32 %s1388_s18, %s1515_s14  ;;  %s29_s23 = sadd.s32 1, %s1384_s17 }
  0x3c   : > { %p27_p8 = scmp.eq.s32.totalorder %s26_s20, 0  ;;  %p36_p13 = scmp.ne.s32.totalorder %s1384_s17, %s1380_s16 }
  0x3d   : > { %p37_p7 = scmp.eq.s32.totalorder %s1388_s18, 0  ;;  %p1187_p10 = scmp.lt.s32.totalorder %s1388_s18, 2 }
  0x3e   : > { %s1525_s24 = scalar_select %p27_p8, %s1384_s17, %s29_s23  }
  0x3f   : > { %p38_p12 = por %p37_p7, %p36_p13  ;;  %p2146_p0 = scmp.eq.s32.totalorder %s1449_s19, 1 }
  0x40   : > { %2145 = sst [smem:[#allocation16_spill]] %s1525_s24  ;;  %s188_s27 = sand.u32 1, %s1384_s17  }
  0x41   : > { %p1529_p9 = por %p2146_p0, %p36_p13  ;;  %s1148_s28 = sshll.u32 %s1388_s18, 10 }
  0x42   : > { %s1098_s29 = sshll.u32 %s188_s27, 6  ;;  %s2148_s0 = sld [smem:[#allocation17_spill]] }
  0x43   : > { %s192_s7 = scalar_lea.vmem [#allocation3], %s1098_s29  ;;  %p1540_p11 = pnand %p1187_p10, %p38_p12 }
  0x44   : > { %s199_s8 = sshll.u32 %s192_s7, 4  ;;  %s1546_s10 = scalar_lea.sflag [#allocation4], %s188_s27  ;;  %s1544_s8 = int_to_ptr.vmem [resolvable:$true] %s199_s8 }
  0x45   : > { %p1286_p1 = pneg %p1540_p11 }
  0x48   : > { %s1538_s6 = scalar_lea.hbm %s2148_s0, %s1148_s28  ;;  %s1289_s20 = scalar_lea.hbm %s2148_s0, 2048 }
  0x49   : > { %s1284_s11 = scalar_lea.hbm %s1538_s6, 1024  ;;  %p1290_p4 = scmp.lt.u32.totalorder %s1538_s6, %s2148_s0 }
  0x4a   : > { %p1285_p3 = scmp.ne.s32.totalorder %s1538_s6, %s1284_s11  ;;  %p1291_p6 = scmp.lt.u32.totalorder %s1289_s20, %s1284_s11 }
  0x4b   : > { %p1293_p13 = scmp.lt.u32.totalorder %s1284_s11, %s1538_s6 }
  0x4c   : > { %p1287_p2 = pnand %p1286_p1, %p1285_p3  ;;  %p1292_p8 = por %p1291_p6, %p1290_p4 }
  0x4e   : > { %p1288_p5 = pneg %p1287_p2  ;;  %p1294_p7 = por %p1293_p13, %p1292_p8 }
  0x50   : > { %p1295_p10 = pnand %p1294_p7, %p1288_p5 }
  0x52   : > { %1298 = shalt.err (!%p1295_p10)
}
  0x53   : > { %s1299_s27 = scalar_lea.vmem %s1544_s8, 1024  ;;  %s1393_s29 = smov [#allocation3]  }
  0x54   : > { %p1300_p12 = scmp.ne.s32.totalorder %s1544_s8, %s1299_s27  ;;  %s1304_s30 = sshll.u32 %s1393_s29, 4  ;;  %s1305_s30 = int_to_ptr.vmem [resolvable:$false] %s1304_s30 }
  0x55   : > { %s1306_s5 = scalar_lea.vmem %s1305_s30, 2048  ;;  %p1307_p2 = scmp.lt.s32.totalorder %s1544_s8, %s1305_s30 }
  0x56   : > { %p1302_p0 = pnand %p1300_p12, %p1286_p1  ;;  %p1308_p4 = scmp.lt.s32.totalorder %s1306_s5, %s1299_s27 }
  0x58   : > { %p1303_p3 = pneg %p1302_p0  ;;  %p1309_p6 = por %p1308_p4, %p1307_p2 }
  0x5a   : > { %p1310_p8 = pnand %p1309_p6, %p1303_p3 }
  0x5c   : > { %1313 = shalt.err (!%p1310_p8)
}
  0x5d   : > { %s1394_s7 = smov 128   ;;  %s1395_s11 = smov 8  }
  0x5e   : > { %1179 = dma.hbm_to_vmem [thread:$0]  (!%p1540_p11), %s1538_s6, 1024, %s1544_s8, %s1546_s10, %s1394_s7, %s1394_s7, %s1395_s11  }
  0x5f   : > { %p2150_p1 = scmp.ne.s32.totalorder %s2141_s26, 0 }
  0x60   : > { %s1577_s12 = sand.u32 (!%p2150_p1), 1, %s1380_s16   ;;  %p2151_p5 = scmp.ne.s32.totalorder (!%p2150_p1), %s2138_s21, 0 }
  0x61   : > { %211 = sbr.rel (%p2150_p1) target bundleno = 489 (0x1e9), region = 36  ;;  %s1102_s13 = sshll.u32 (!%p2150_p1), %s1577_s12, 6 }
  0x62   : > { %s214_s20 = scalar_lea.sflag (!%p2150_p1), [#allocation4], %s1577_s12  ;;  %s1581_s23 = scalar_lea.vmem (!%p2150_p1), [#allocation3], %s1102_s13 }
  0x68   : > { %1359 = dma.done.wait (%p2151_p5), %s214_s20, 1024  }
  0x69   : > { %1361 = vsyncadd (%p2151_p5), %s214_s20, 4294966272  ;;  %p2152_p11 = scmp.eq.s32.totalorder %s1449_s19, 0 }
  0x6b   : > { %1363 = dma.done.wait (%p2152_p11), [#allocation6], 16   ;;  %p2153_p13 = pmov %p2152_p11 }
  0x6c   : > { %p2154_p7 = pmov %p2152_p11 }
  0x6d   : > { %1365 = vsyncadd (%p2153_p13), [#allocation6], 4294967280 }
  0x6e   : > { %1367 = dma.done.wait (%p2154_p7), [#allocation9], 32   ;;  %p2155_p10 = pmov %p2154_p7 }
  0x70   : > { %1369 = vsyncadd (%p2155_p10), [#allocation9], 4294967264 }
  0x71   : > { %234 = sfence }
  0x72   : > { %v269_v0 = vld [vmem:[%s1581_s23] sm:$0xff]  ;;  %v271_v1 = vld [vmem:[%s1581_s23 + $0x10] sm:$0xff]  ;;  %vm255_vm0 = vcmask 146432   ;;  %s1396_s21 = smov 1   ;;  %vm258_vm1 = vcmask 140288   ;;  %v270_v2 = vld [vmem:[%s1581_s23 + $0x8] sm:$0xff] }
  0x73   : > { %285 = vrot.lane.b32.xlu0 %v269_v0, %s1396_s21  ;;  %289 = vrot.lane.b32.xlu1 %v271_v1, %s1396_s21  ;;  %v272_v3 = vld [vmem:[%s1581_s23 + $0x18] sm:$0xff]  ;;  %v1397_v4 = vmov 0.0   ;;  %v273_v5 = vld [vmem:[%s1581_s23 + $0x20] sm:$0xff]  ;;  %vm309_vm2 = vcmask 138248   ;;  %s1108_s26 = sld [smem:[#allocation7 + $0x1]]  ;;  %s1605_s6 = sld [smem:[#allocation7 + $0x2]] }
  0x74   : > { %256 = vst.msk [vmem:[#allocation2] sm:$0xff] %vm255_vm0, %v1397_v4  ;;  %257 = vst.msk [vmem:[#allocation2 + $0x8] sm:$0xff] %vm255_vm0, %v1397_v4  ;;  %v274_v6 = vld [vmem:[%s1581_s23 + $0x28] sm:$0xff]  ;;  %v275_v7 = vld [vmem:[%s1581_s23 + $0x30] sm:$0xff]  ;;  %s1607_s8 = sld [smem:[#allocation7 + $0xa]]  ;;  %s1617_s9 = sld [smem:[#allocation7 + $0xb]] }
  0x75   : > { %260 = vst.msk [vmem:[#allocation2 + $0x18] sm:$0xff] %vm255_vm0, %v1397_v4  ;;  %261 = vst.msk [vmem:[#allocation2 + $0x20] sm:$0xff] %vm255_vm0, %v1397_v4  ;;  %v276_v8 = vld [vmem:[%s1581_s23 + $0x38] sm:$0xff]  ;;  %s2132_s10 = smov 127   ;;  %s1625_s28 = sld [smem:[#allocation7 + $0x13]]  ;;  %vm365_vm3 = vcmask 1046528  }
  0x76   : > { %263 = vst.msk [vmem:[#allocation2 + $0x30] sm:$0xff] %vm255_vm0, %v1397_v4  ;;  %264 = vst.msk [vmem:[#allocation2 + $0x38] sm:$0xff] %vm255_vm0, %v1397_v4  ;;  %s2130_s27 = smov 126   ;;  %s1634_s29 = sld [smem:[#allocation7 + $0x4]]  ;;  %vm425_vm4 = vcmask 1045504   ;;  %vm971_vm6 = vcmask 130048  }
  0x77   : > { %266 = vst.msk [vmem:[#allocation2 + $0x48] sm:$0xff] %vm255_vm0, %v1397_v4  ;;  %267 = vst.msk [vmem:[#allocation2 + $0x50] sm:$0xff] %vm255_vm0, %v1397_v4  ;;  %287 = vrot.lane.b32.xlu0 %v270_v2, %s1396_s21  ;;  %291 = vrot.lane.b32.xlu1 %v272_v3, %s1396_s21  ;;  %s1636_s30 = sld [smem:[#allocation7 + $0x14]]  ;;  %s1638_s5 = sld [smem:[#allocation7 + $0x5]] }
  0x78   : > { %259 = vst.msk [vmem:[#allocation2 + $0x10] sm:$0x3] %vm258_vm1, %v1397_v4  ;;  %262 = vst.msk [vmem:[#allocation2 + $0x28] sm:$0x3] %vm258_vm1, %v1397_v4  ;;  %s1641_s7 = sld [smem:[#allocation7 + $0x7]]  ;;  %s1643_s11 = sld [smem:[#allocation7 + $0x8]] }
  0x79   : > { %265 = vst.msk [vmem:[#allocation2 + $0x40] sm:$0x3] %vm258_vm1, %v1397_v4  ;;  %268 = vst.msk [vmem:[#allocation2 + $0x58] sm:$0x3] %vm258_vm1, %v1397_v4  ;;  %v330_v13 = vstv %s1108_s26  ;;  %v344_v18 = vstv %s1605_s6  ;;  %s1648_s13 = sld [smem:[#allocation7 + $0xd]]  ;;  %s1650_s20 = sld [smem:[#allocation7 + $0xe]] }
  0x7a   : > { %v488_v21 = vstv %s1607_s8  ;;  %v502_v29 = vstv %s1617_s9  ;;  %s1654_s23 = sld [smem:[#allocation7 + $0x10]]  ;;  %s1661_s26 = sld [smem:[#allocation7 + $0x16]] }
  0x7b   : > { %293 = vrot.lane.b32.xlu0 %v273_v5, %s1396_s21  ;;  %295 = vrot.lane.b32.xlu1 %v274_v6, %s1396_s21  ;;  %v644_v31 = vstv %s1625_s28  ;;  %s1663_s6 = sld [smem:[#allocation7 + $0x17]]  ;;  %s1667_s8 = sld [smem:[#allocation7 + $0x3]] }
  0x7c   : > { %s1669_s9 = sld [smem:[#allocation7 + $0x6]]  ;;  %s2156_s28 = smov 127   ;;  %v376_v38 = vstv %s1634_s29 }
  0x7d   : > { %s2157_s0 = smov 126   ;;  %s1678_s1 = sld [smem:[#allocation7 + $0x1c]]  ;;  %v658_v36 = vstv %s1636_s30  ;;  %v397_v41 = vstv %s1638_s5 }
  0x7e   : > { %s1680_s2 = sld [smem:[#allocation7 + $0x15]]  ;;  %s1685_s3 = sld [smem:[#allocation7 + $0x18]]  ;;  %v436_v42 = vstv %s1641_s7  ;;  %v457_v43 = vstv %s1643_s11 }
  0x7f   : > { %297 = vrot.lane.b32.xlu0 %v275_v7, %s1396_s21  ;;  %299 = vrot.lane.b32.xlu1 %v276_v8, %s1396_s21  ;;  %s1656_s21 = sld [smem:[#allocation7 + $0x11]]  ;;  %s1687_s24 = sld [smem:[#allocation7 + $0x1e]]  ;;  %v533_v46 = vstv %s1648_s13  ;;  %v1703_v47 = vstv %s1650_s20 }
  0x80   : > { %s1705_s29 = sld [smem:[#allocation7 + $0x21]]  ;;  %v1709_v49 = vstv %s1654_s23  ;;  %v1715_v51 = vstv %s1661_s26  ;;  %s1142_s30 = sld [smem:[#allocation7 + $0x23]] }
  0x81   : > { %v1719_v53 = vstv %s1663_s6  ;;  %v1722_v54 = vstv %s1667_s8  ;;  %s323_s5 = sld [smem:[#allocation7]]  ;;  %s1125_s7 = sld [smem:[#allocation7 + $0x12]] }
  0x82   : > { %v1725_v55 = vstv %s1669_s9  ;;  %s1134_s11 = sld [smem:[#allocation7 + $0x1b]]  ;;  %s318_s13 = sld [smem:[#allocation10]] }
  0x83   : > { %v800_v60 = vstv %s1678_s1  ;;  %s1921_s1 = sld [smem:[#allocation7 + $0x19]]  ;;  %s1106_s23 = sshll.u32 %s1577_s12, 4 }
  0x84   : > { %v1738_v61 = vstv %s1680_s2  ;;  %v1742_v0 = vstv %s1685_s3  ;;  %s1133_s2 = sld [smem:[#allocation7 + $0x1a]]  ;;  %s1138_s3 = sld [smem:[#allocation7 + $0x1f]] }
  0x85   : > { %v1712_v50 = vstv %s1656_s21  ;;  %v1745_v1 = vstv %s1687_s24  ;;  %s1983_s24 = sld [smem:[#allocation7 + $0x1d]]  ;;  %s1107_s20 = sld [smem:[#allocation10 + $0x1]] }
  0x86   : > { %s1149_s21 = sshll.u32 %s1449_s19, 8  ;;  %s254_s26 = scalar_lea.vmem [#allocation11], %s1106_s23 }
  0x87   : > { %s988_s6 = sshll.u32 %s254_s26, 4  ;;  %s975_s19 = scalar_lea.sflag [#allocation5], %s1577_s12  ;;  %s2077_s6 = int_to_ptr.vmem [resolvable:$true] %s988_s6 }
  0xe5   : > { %v286_v9 = vpop.permute.xlu0 %285  ;;  %v290_v10 = vpop.permute.xlu1 %289 }
  0xe6   : > { %310 = vst.msk [vmem:[#allocation2 + $0x1] sm:$0xff] %vm309_vm2, %v286_v9  ;;  %312 = vst.msk [vmem:[#allocation2 + $0x19] sm:$0xff] %vm309_vm2, %v290_v10 }
  0xe9   : > { %v288_v11 = vpop.permute.xlu0 %287  ;;  %v292_v12 = vpop.permute.xlu1 %291 }
  0xea   : > { %311 = vst.msk [vmem:[#allocation2 + $0x9] sm:$0xff] %vm309_vm2, %v288_v11  ;;  %313 = vst.msk [vmem:[#allocation2 + $0x21] sm:$0xff] %vm309_vm2, %v292_v12 }
  0xed   : > { %v1611_v14 = vld [vmem:[#allocation2] sm:$0xff]  ;;  %v294_v15 = vpop.permute.xlu0 %293  ;;  %v296_v16 = vpop.permute.xlu1 %295  ;;  %v1622_v20 = vld [vmem:[#allocation2 + $0x18] sm:$0xff] }
  0xee   : > { %v331_v17 = vmul.f32 %v330_v13, %v1611_v14  ;;  %314 = vst.msk [vmem:[#allocation2 + $0x31] sm:$0xff] %vm309_vm2, %v294_v15  ;;  %315 = vst.msk [vmem:[#allocation2 + $0x39] sm:$0xff] %vm309_vm2, %v296_v16  ;;  %v345_v25 = vmul.f32 %v344_v18, %v1611_v14  ;;  %v489_v26 = vmul.f32 %v488_v21, %v1622_v20  ;;  %v1761_v15 = vstv %s1705_s29  ;;  %s1314_s29 = scalar_lea.vmem %s2077_s6, 256 }
  0xef   : > { %v503_v33 = vmul.f32 %v502_v29, %v1622_v20  ;;  %v377_v48 = vmul.f32 %v376_v38, %v1611_v14  ;;  %v398_v63 = vmul.f32 %v397_v41, %v1611_v14  ;;  %v534_v12 = vmul.f32 %v533_v46, %v1622_v20  ;;  %p1315_p12 = scmp.ne.s32.totalorder %s2077_s6, %s1314_s29 }
  0xf0   : > { %335 = vrot.lane.b32.xlu0 %v331_v17, %s2132_s10  ;;  %v437_v17 = vmul.f32 %v436_v42, %v1611_v14 }
  0xf1   : > { %v1620_v19 = vld [vmem:[#allocation2 + $0x8] sm:$0xff]  ;;  %v298_v22 = vpop.permute.xlu0 %297  ;;  %v300_v23 = vpop.permute.xlu1 %299  ;;  %v1645_v28 = vld [vmem:[#allocation2 + $0x20] sm:$0xff]  ;;  %v1692_v40 = vld [vmem:[#allocation2 + $0x10] sm:$0x3]  ;;  %v383_v62 = vrot.slane %v377_v48, 1  ;;  %v404_v16 = vrot.slane %v398_v63, 1  ;;  %v359_v48 = vmul.f32 %v1722_v54, %v1611_v14  ;;  %p1316_p0 = pnand %p1315_p12, %p1529_p9 }
  0xf2   : > { %v332_v24 = vmul.f32 %v330_v13, %v1620_v19  ;;  %316 = vst.msk [vmem:[#allocation2 + $0x49] sm:$0xff] %vm309_vm2, %v298_v22  ;;  %317 = vst.msk [vmem:[#allocation2 + $0x51] sm:$0xff] %vm309_vm2, %v300_v23  ;;  %v346_v27 = vmul.f32 %v344_v18, %v1620_v19  ;;  %v490_v32 = vmul.f32 %v488_v21, %v1645_v28  ;;  %v1750_v6 = vld [vmem:[#allocation2 + $0x28] sm:$0x3] }
  0xf3   : > { %v504_v37 = vmul.f32 %v502_v29, %v1645_v28  ;;  %v378_v39 = vmul.f32 %v376_v38, %v1620_v19  ;;  %v379_v52 = vmul.f32 %v376_v38, %v1692_v40  ;;  %v399_v57 = vmul.f32 %v397_v41, %v1620_v19  ;;  %p1317_p3 = pneg %p1316_p0 }
  0xf4   : > { %337 = vrot.lane.b32.xlu1 %v332_v24, %s2132_s10  ;;  %349 = vrot.lane.b32.xlu0 %v345_v25, %s2130_s27  ;;  %v400_v4 = vmul.f32 %v397_v41, %v1692_v40  ;;  %v438_v5 = vmul.f32 %v436_v42, %v1620_v19  ;;  %v439_v9 = vmul.f32 %v436_v42, %v1692_v40  ;;  %v443_v38 = vrot.slane %v437_v17, 2 }
  0xf5   : > { %v1658_v30 = vld [vmem:[#allocation2 + $0x30] sm:$0xff]  ;;  %v1682_v35 = vld [vmem:[#allocation2 + $0x38] sm:$0xff]  ;;  %v384_v56 = vrot.slane %v378_v39, 1  ;;  %v386_v3 = vrot.slane %v379_v52, 1  ;;  %v405_v8 = vrot.slane %v399_v57, 1  ;;  %v459_v10 = vmul.f32 %v457_v43, %v1620_v19 }
  0xf6   : > { %v645_v34 = vmul.f32 %v644_v31, %v1658_v30  ;;  %v646_v44 = vmul.f32 %v644_v31, %v1682_v35  ;;  %v659_v45 = vmul.f32 %v658_v36, %v1658_v30  ;;  %v660_v2 = vmul.f32 %v658_v36, %v1682_v35 }
  0xf7   : > { %v385_v7 = vsel %vm365_vm3, %v383_v62, %v384_v56  ;;  %v460_v11 = vmul.f32 %v457_v43, %v1692_v40  ;;  %v535_v13 = vmul.f32 %v533_v46, %v1645_v28  ;;  %v458_v18 = vmul.f32 %v457_v43, %v1611_v14 }
  0xf8   : > { %351 = vrot.lane.b32.xlu1 %v346_v27, %s2130_s27  ;;  %493 = vrot.lane.b32.xlu0 %v489_v26, %s2132_s10  ;;  %s1671_s27 = sld [smem:[#allocation7 + $0xc]]  ;;  %s1673_s10 = sld [smem:[#allocation7 + $0xf]]  ;;  %v536_v21 = vmul.f32 %v533_v46, %v1750_v6  ;;  %v387_v22 = vsel %vm365_vm3, %v384_v56, %v386_v3  ;;  %v407_v23 = vrot.slane %v400_v4, 1  ;;  %v1769_v24 = vmul.f32 %v1703_v47, %v1622_v20 }
  0xf9   : > { %v1773_v25 = vmul.f32 %v1709_v49, %v1622_v20  ;;  %v406_v26 = vsel %vm365_vm3, %v404_v16, %v405_v8  ;;  %v444_v27 = vrot.slane %v438_v5, 2  ;;  %v446_v29 = vrot.slane %v439_v9, 2  ;;  %v1784_v41 = vld [vmem:[#allocation2 + $0x50] sm:$0xff] }
  0xfa   : > { %v465_v31 = vrot.slane %v459_v10, 2  ;;  %v541_v36 = vrot.slane %v535_v13, 1  ;;  %v464_v39 = vrot.slane %v458_v18, 2  ;;  %v543_v42 = vrot.slane %v536_v21, 1 }
  0xfb   : > { %v1788_v43 = vmul.f32 %v1703_v47, %v1645_v28  ;;  %v1797_v46 = vmul.f32 %v1709_v49, %v1645_v28  ;;  %v445_v52 = vsel %vm425_vm4, %v443_v38, %v444_v27  ;;  %v447_v56 = vsel %vm425_vm4, %v444_v27, %v446_v29 }
  0xfc   : > { %495 = vrot.lane.b32.xlu1 %v490_v32, %s2156_s28  ;;  %507 = vrot.lane.b32.xlu0 %v503_v33, %s2157_s0  ;;  %v467_v32 = vrot.slane %v460_v11, 2  ;;  %v1778_v33 = vld [vmem:[#allocation2 + $0x48] sm:$0xff]  ;;  %v466_v57 = vsel %vm425_vm4, %v464_v39, %v465_v31  ;;  %v802_v63 = vmul.f32 %v800_v60, %v1784_v41  ;;  %v561_v3 = vrot.slane %v1769_v24, 1 }
  0xfd   : > { %v801_v62 = vmul.f32 %v800_v60, %v1778_v33  ;;  %v1812_v4 = vsel %vm365_vm3, %v541_v36, %v543_v42  ;;  %v562_v5 = vrot.slane %v1788_v43, 1  ;;  %v600_v10 = vrot.slane %v1797_v46, 2 }
  0xfe   : > { %v1729_v58 = vstv %s1671_s27  ;;  %v1732_v59 = vstv %s1673_s10  ;;  %v366_v11 = vrot.slane %v359_v48, 1  ;;  %v361_v60 = vmul.f32 %v1722_v54, %v1692_v40  ;;  %s1139_s10 = sld [smem:[#allocation7 + $0x20]]  ;;  %s1141_s27 = sld [smem:[#allocation7 + $0x22]] }
  0xff   : > { %v419_v13 = vmul.f32 %v1725_v55, %v1611_v14  ;;  %v420_v16 = vmul.f32 %v1725_v55, %v1620_v19  ;;  %v421_v17 = vmul.f32 %v1725_v55, %v1692_v40  ;;  %v1832_v18 = vmul.f32 %v1709_v49, %v1750_v6 }
 0x100   : > { %509 = vrot.lane.b32.xlu1 %v504_v37, %s2157_s0  ;;  %649 = vrot.lane.b32.xlu0 %v645_v34, %s2156_s28  ;;  %v540_v34 = vrot.slane %v534_v12, 1  ;;  %v1782_v37 = vmul.f32 %v1712_v50, %v1622_v20  ;;  %v518_v27 = vmul.f32 %v1729_v58, %v1645_v28  ;;  %v577_v39 = vmul.f32 %v1732_v59, %v1645_v28 }
 0x101   : > { %v426_v24 = vrot.slane %v419_v13, 2  ;;  %v427_v40 = vrot.slane %v420_v16, 2  ;;  %v429_v55 = vrot.slane %v421_v17, 2  ;;  %v578_v42 = vmul.f32 %v1732_v59, %v1750_v6 }
 0x102   : > { %v620_v21 = vrot.slane %v1782_v37, 2  ;;  %v524_v38 = vrot.slane %v518_v27, 1  ;;  %v563_v43 = vsel %vm365_vm3, %v561_v3, %v562_v5  ;;  %v888_v27 = vmul.f32 %v1761_v15, %v1778_v33 }
 0x103   : > { %v1854_v29 = vsel %vm425_vm4, %v426_v24, %v427_v40  ;;  %v829_v24 = vmul.f32 %v1745_v1, %v1778_v33 }
 0x104   : > { %651 = vrot.lane.b32.xlu1 %v646_v44, %s2156_s28  ;;  %663 = vrot.lane.b32.xlu0 %v659_v45, %s2157_s0  ;;  %v408_v44 = vsel %vm365_vm3, %v405_v8, %v407_v23  ;;  %v1793_v45 = vmul.f32 %v1703_v47, %v1750_v6  ;;  %v468_v47 = vsel %vm425_vm4, %v465_v31, %v467_v32 }
 0x105   : > { %v360_v8 = vmul.f32 %v1722_v54, %v1620_v19  ;;  %v1836_v54 = vmul.f32 %v1712_v50, %v1645_v28  ;;  %v1857_v31 = vsel %vm425_vm4, %v427_v40, %v429_v55  ;;  %v519_v32 = vmul.f32 %v1729_v58, %v1750_v6 }
 0x106   : > { %v564_v9 = vrot.slane %v1793_v45, 1 }
 0x107   : > { %v367_v12 = vrot.slane %v360_v8, 1 }
 0x108   : > { %665 = vrot.lane.b32.xlu1 %v660_v2, %s2157_s0  ;;  %388 = vrot.lane.b32.xlu0 %v385_v7, %s2156_s28  ;;  %v542_v2 = vsel %vm365_vm3, %v540_v34, %v541_v36  ;;  %v599_v7 = vrot.slane %v1773_v25, 2  ;;  %v1844_v25 = vmul.f32 %v1712_v50, %v1750_v6  ;;  %v576_v50 = vmul.f32 %v1732_v59, %v1622_v20  ;;  %v1865_v34 = vld [vmem:[#allocation2 + $0x40] sm:$0x3] }
 0x109   : > { %v1840_v23 = vsel %vm365_vm3, %v366_v11, %v367_v12  ;;  %v674_v59 = vmul.f32 %v1738_v61, %v1682_v35  ;;  %v675_v6 = vmul.f32 %v1738_v61, %v1865_v34  ;;  %v713_v46 = vmul.f32 %v1719_v53, %v1865_v34 }
 0x10a   : > { %v582_v45 = vrot.slane %v576_v50, 2  ;;  %v601_v17 = vsel %vm425_vm4, %v599_v7, %v600_v10  ;;  %v835_v7 = vrot.slane %v829_v24, 1 }
 0x10b   : > { %v682_v13 = vrot.slane %v675_v6, 1  ;;  %v712_v6 = vmul.f32 %v1719_v53, %v1682_v35 }
 0x10c   : > { %390 = vrot.lane.b32.xlu1 %v387_v22, %s2156_s28  ;;  %409 = vrot.lane.b32.xlu0 %v406_v26, %s2157_s0  ;;  %v369_v22 = vrot.slane %v361_v60, 1  ;;  %v517_v26 = vmul.f32 %v1729_v58, %v1622_v20  ;;  %v1874_v58 = vmul.f32 %v1715_v51, %v1658_v30  ;;  %v733_v60 = vmul.f32 %v1742_v0, %v1682_v35 }
 0x10e   : > { %v1847_v49 = vsel %vm365_vm3, %v367_v12, %v369_v22  ;;  %v523_v36 = vrot.slane %v517_v26, 1  ;;  %v1900_v12 = vld [vmem:[#allocation2 + $0x58] sm:$0x3]  ;;  %v739_v22 = vrot.slane %v733_v60, 2  ;;  %v696_v60 = vrot.slane %v1874_v58, 1 }
 0x110   : > { %411 = vrot.lane.b32.xlu1 %v408_v44, %s2157_s0  ;;  %448 = vrot.lane.b32.xlu0 %v445_v52, %s2156_s28  ;;  %v526_v44 = vrot.slane %v519_v32, 1  ;;  %v1877_v48 = vsel %vm365_vm3, %v523_v36, %v524_v38  ;;  %v583_v52 = vrot.slane %v577_v39, 2  ;;  %v890_v36 = vmul.f32 %v1761_v15, %v1900_v12 }
 0x111   : > { %v621_v39 = vrot.slane %v1836_v54, 2 }
 0x112   : > { %v1893_v3 = vsel %vm425_vm4, %v582_v45, %v583_v52 }
 0x114   : > { %450 = vrot.lane.b32.xlu1 %v447_v56, %s2156_s28  ;;  %469 = vrot.lane.b32.xlu0 %v466_v57, %s2157_s0  ;;  %v585_v56 = vrot.slane %v578_v42, 2  ;;  %v673_v57 = vmul.f32 %v1738_v61, %v1658_v30  ;;  %v680_v61 = vrot.slane %v674_v59, 1  ;;  %v711_v59 = vmul.f32 %v1719_v53, %v1658_v30 }
 0x116   : > { %v1896_v8 = vsel %vm425_vm4, %v583_v52, %v585_v56  ;;  %v679_v11 = vrot.slane %v673_v57, 1  ;;  %v1914_v55 = vsel %vm365_vm3, %v680_v61, %v682_v13  ;;  %v897_v52 = vrot.slane %v890_v36, 2 }
 0x117   : > { %v623_v56 = vrot.slane %v1844_v25, 2  ;;  %v692_v57 = vmul.f32 %v1715_v51, %v1865_v34  ;;  %v717_v13 = vrot.slane %v711_v59, 1 }
 0x118   : > { %471 = vrot.lane.b32.xlu1 %v468_v47, %s2157_s0  ;;  %805 = vrot.lane.b32.xlu0 %v801_v62, %s2156_s28  ;;  %v1882_v62 = vsel %vm365_vm3, %v524_v38, %v526_v44  ;;  %v732_v47 = vmul.f32 %v1742_v0, %v1658_v30  ;;  %v1911_v40 = vsel %vm365_vm3, %v679_v11, %v680_v61  ;;  %v602_v38 = vrot.slane %v1832_v18, 2 }
 0x119   : > { %v622_v11 = vsel %vm425_vm4, %v620_v21, %v621_v39  ;;  %v699_v61 = vrot.slane %v692_v57, 1 }
 0x11a   : > { %v738_v16 = vrot.slane %v732_v47, 2  ;;  %v603_v47 = vsel %vm425_vm4, %v600_v10, %v602_v38  ;;  %v624_v10 = vsel %vm425_vm4, %v621_v39, %v623_v56  ;;  %v845_v39 = vstv %s1138_s3 }
 0x11b   : > { %v846_v56 = vmul.f32 %v845_v39, %v1778_v33  ;;  %v847_v57 = vmul.f32 %v845_v39, %v1784_v41  ;;  %v848_v59 = vmul.f32 %v845_v39, %v1900_v12 }
 0x11c   : > { %807 = vrot.lane.b32.xlu1 %v802_v63, %s2156_s28  ;;  %545 = vrot.lane.b32.xlu0 %v542_v2, %s2156_s28  ;;  %v734_v63 = vmul.f32 %v1742_v0, %v1865_v34  ;;  %v565_v2 = vsel %vm365_vm3, %v562_v5, %v564_v9  ;;  %v830_v0 = vmul.f32 %v1745_v1, %v1784_v41 }
 0x11d   : > { %v1924_v5 = vsel %vm425_vm4, %v738_v16, %v739_v22  ;;  %v831_v9 = vmul.f32 %v1745_v1, %v1900_v12  ;;  %v691_v1 = vmul.f32 %v1715_v51, %v1682_v35  ;;  %v748_v51 = vstv %s1921_s1  ;;  %s1400_s1 = smov [#allocation11]  }
 0x11e   : > { %v741_v26 = vrot.slane %v734_v63, 2  ;;  %v836_v50 = vrot.slane %v830_v0, 1  ;;  %v718_v16 = vrot.slane %v712_v6, 1  ;;  %v749_v21 = vmul.f32 %v748_v51, %v1658_v30 }
 0x11f   : > { %v838_v42 = vrot.slane %v831_v9, 1  ;;  %v697_v25 = vrot.slane %v691_v1, 1  ;;  %v750_v58 = vmul.f32 %v748_v51, %v1682_v35  ;;  %v769_v63 = vstv %s1133_s2  ;;  %s1318_s2 = sshll.u32 %s1400_s1, 4  ;;  %s1319_s2 = int_to_ptr.vmem [resolvable:$false] %s1318_s2 }
 0x120   : > { %547 = vrot.lane.b32.xlu1 %v1812_v4, %s2156_s28  ;;  %566 = vrot.lane.b32.xlu0 %v563_v43, %s2157_s0  ;;  %v1931_v32 = vsel %vm425_vm4, %v739_v22, %v741_v26  ;;  %v889_v4 = vmul.f32 %v1761_v15, %v1784_v41  ;;  %v894_v43 = vrot.slane %v888_v27, 2  ;;  %v1942_v44 = vsel %vm365_vm3, %v835_v7, %v836_v50  ;;  %s1320_s3 = scalar_lea.vmem %s1319_s2, 512  ;;  %p1321_p2 = scmp.lt.s32.totalorder %s2077_s6, %s1319_s2 }
 0x121   : > { %v1947_v15 = vsel %vm365_vm3, %v836_v50, %v838_v42  ;;  %v698_v37 = vsel %vm365_vm3, %v696_v60, %v697_v25  ;;  %v720_v22 = vrot.slane %v713_v46, 1  ;;  %v751_v53 = vmul.f32 %v748_v51, %v1865_v34  ;;  %p1322_p4 = scmp.lt.s32.totalorder %s1320_s3, %s1314_s29 }
 0x122   : > { %v895_v45 = vrot.slane %v889_v4, 2  ;;  %v755_v24 = vrot.slane %v749_v21, 2  ;;  %v756_v26 = vrot.slane %v750_v58, 2  ;;  %v770_v0 = vmul.f32 %v769_v63, %v1658_v30 }
 0x123   : > { %v771_v7 = vmul.f32 %v769_v63, %v1682_v35  ;;  %v721_v9 = vsel %vm365_vm3, %v718_v16, %v720_v22  ;;  %v758_v27 = vrot.slane %v751_v53, 2  ;;  %v772_v38 = vmul.f32 %v769_v63, %v1865_v34  ;;  %p1323_p6 = por %p1322_p4, %p1321_p2 }
 0x124   : > { %568 = vrot.lane.b32.xlu1 %v565_v2, %s2157_s0  ;;  %604 = vrot.lane.b32.xlu0 %v601_v17, %s2156_s28  ;;  %v1950_v18 = vsel %vm425_vm4, %v894_v43, %v895_v45  ;;  %v1953_v54 = vsel %vm425_vm4, %v895_v45, %v897_v52  ;;  %v700_v2 = vsel %vm365_vm3, %v697_v25, %v699_v61  ;;  %v776_v4 = vrot.slane %v770_v0, 2 }
 0x125   : > { %v719_v17 = vsel %vm365_vm3, %v717_v13, %v718_v16  ;;  %v757_v50 = vsel %vm425_vm4, %v755_v24, %v756_v26  ;;  %v777_v36 = vrot.slane %v771_v7, 2  ;;  %v759_v42 = vsel %vm425_vm4, %v756_v26, %v758_v27  ;;  %p1324_p8 = pnand %p1323_p6, %p1317_p3 }
 0x126   : > { %v814_v43 = vstv %s1983_s24  ;;  %v866_v1 = vstv %s1139_s10  ;;  %v779_v52 = vrot.slane %v772_v38, 2  ;;  %v853_v60 = vrot.slane %v847_v57, 1 }
 0x127   : > { %v778_v45 = vsel %vm425_vm4, %v776_v4, %v777_v36  ;;  %v815_v34 = vmul.f32 %v814_v43, %v1778_v33  ;;  %v867_v6 = vmul.f32 %v866_v1, %v1778_v33  ;;  %v868_v25 = vmul.f32 %v866_v1, %v1784_v41 }
 0x128   : > { %606 = vrot.lane.b32.xlu1 %v603_v47, %s2156_s28  ;;  %625 = vrot.lane.b32.xlu0 %v622_v11, %s2157_s0  ;;  %v780_v47 = vsel %vm425_vm4, %v777_v36, %v779_v52  ;;  %v852_v11 = vrot.slane %v846_v56, 1  ;;  %v904_v51 = vstv %s1141_s27  ;;  %v925_v61 = vstv %s1142_s30 }
 0x129   : > { %v816_v13 = vmul.f32 %v814_v43, %v1784_v41  ;;  %v855_v16 = vrot.slane %v848_v59, 1  ;;  %v873_v46 = vrot.slane %v867_v6, 1  ;;  %v874_v21 = vrot.slane %v868_v25, 1 }
 0x12a   : > { %v905_v58 = vmul.f32 %v904_v51, %v1778_v33  ;;  %v906_v63 = vmul.f32 %v904_v51, %v1784_v41  ;;  %v907_v22 = vmul.f32 %v904_v51, %v1900_v12  ;;  %v926_v53 = vmul.f32 %v925_v61, %v1778_v33 }
 0x12b   : > { %v875_v24 = vsel %vm365_vm3, %v873_v46, %v874_v21  ;;  %v927_v7 = vmul.f32 %v925_v61, %v1784_v41  ;;  %v928_v38 = vmul.f32 %v925_v61, %v1900_v12 }
 0x12c   : > { %627 = vrot.lane.b32.xlu1 %v624_v10, %s2157_s0  ;;  %701 = vrot.lane.b32.xlu0 %v698_v37, %s2156_s28  ;;  %v869_v10 = vmul.f32 %v866_v1, %v1900_v12  ;;  %v854_v37 = vsel %vm365_vm3, %v852_v11, %v853_v60  ;;  %v911_v26 = vrot.slane %v905_v58, 2  ;;  %v912_v0 = vrot.slane %v906_v63, 2 }
 0x12d   : > { %v914_v27 = vrot.slane %v907_v22, 2  ;;  %v932_v4 = vrot.slane %v926_v53, 2  ;;  %v933_v36 = vrot.slane %v927_v7, 2  ;;  %v935_v43 = vrot.slane %v928_v38, 2 }
 0x12f   : > { %v915_v39 = vsel %vm425_vm4, %v912_v0, %v914_v27  ;;  %v936_v1 = vsel %vm425_vm4, %v933_v36, %v935_v43 }
 0x130   : > { %703 = vrot.lane.b32.xlu1 %v700_v2, %s2156_s28  ;;  %722 = vrot.lane.b32.xlu0 %v719_v17, %s2157_s0  ;;  %v856_v2 = vsel %vm365_vm3, %v853_v60, %v855_v16  ;;  %v876_v17 = vrot.slane %v869_v10, 1 }
 0x134   : > { %724 = vrot.lane.b32.xlu1 %v721_v9, %s2157_s0  ;;  %760 = vrot.lane.b32.xlu0 %v757_v50, %s2156_s28  ;;  %v877_v9 = vsel %vm365_vm3, %v874_v21, %v876_v17  ;;  %v913_v50 = vsel %vm425_vm4, %v911_v26, %v912_v0 }
 0x138   : > { %762 = vrot.lane.b32.xlu1 %v759_v42, %s2156_s28  ;;  %781 = vrot.lane.b32.xlu0 %v778_v45, %s2157_s0  ;;  %v934_v42 = vsel %vm425_vm4, %v932_v4, %v933_v36  ;;  %v324_v45 = vstv %s323_s5 }
 0x139   : > { %v325_v52 = vmul.f32 %v324_v45, %v1611_v14  ;;  %v326_v59 = vmul.f32 %v324_v45, %v1620_v19 }
 0x13c   : > { %783 = vrot.lane.b32.xlu1 %v780_v47, %s2157_s0  ;;  %819 = vrot.lane.b32.xlu0 %v815_v34, %s2157_s0 }
 0x140   : > { %821 = vrot.lane.b32.xlu1 %v816_v13, %s2157_s0  ;;  %857 = vrot.lane.b32.xlu0 %v854_v37, %s2156_s28 }
 0x144   : > { %859 = vrot.lane.b32.xlu1 %v856_v2, %s2156_s28  ;;  %878 = vrot.lane.b32.xlu0 %v875_v24, %s2157_s0 }
 0x148   : > { %880 = vrot.lane.b32.xlu1 %v877_v9, %s2157_s0  ;;  %916 = vrot.lane.b32.xlu0 %v913_v50, %s2156_s28 }
 0x14c   : > { %918 = vrot.lane.b32.xlu1 %v915_v39, %s2156_s28  ;;  %937 = vrot.lane.b32.xlu0 %v934_v42, %s2157_s0  ;;  %s2075_s28 = scalar_lea.hbm %s2126_s4, %s1149_s21 }
 0x150   : > { %939 = vrot.lane.b32.xlu1 %v936_v1, %s2157_s0  ;;  %s1116_s0 = sld [smem:[#allocation7 + $0x9]] }
 0x156   : > { %v482_v26 = vstv %s1116_s0 }
 0x157   : > { %v483_v50 = vmul.f32 %v482_v26, %v1622_v20 }
 0x162   : > { %v336_v12 = vpop.permute.xlu0 %335 }
 0x163   : > { %v341_v56 = vadd.f32 %v336_v12, %v325_v52 }
 0x166   : > { %v338_v57 = vpop.permute.xlu1 %337  ;;  %v350_v34 = vpop.permute.xlu0 %349 }
 0x167   : > { %v355_v6 = vadd.f32 %v350_v34, %v341_v56  ;;  %v342_v47 = vadd.f32 %v338_v57, %v326_v59 }
 0x169   : > { %v373_v11 = vadd.f32 %v1840_v23, %v355_v6 }
 0x16a   : > { %v352_v60 = vpop.permute.xlu1 %351  ;;  %v494_v25 = vpop.permute.xlu0 %493 }
 0x16b   : > { %v356_v51 = vadd.f32 %v352_v60, %v342_v47 }
 0x16d   : > { %v374_v61 = vadd.f32 %v1847_v49, %v356_v51 }
 0x16e   : > { %v496_v13 = vpop.permute.xlu1 %495  ;;  %v508_v16 = vpop.permute.xlu0 %507 }
 0x172   : > { %v510_v46 = vpop.permute.xlu1 %509  ;;  %v650_v10 = vpop.permute.xlu0 %649 }
 0x176   : > { %v2037_v37 = vpop.permute.xlu1 %651  ;;  %v664_v14 = vpop.permute.xlu0 %663 }
 0x17a   : > { %v2039_v21 = vpop.permute.xlu1 %665  ;;  %v389_v58 = vpop.permute.xlu0 %388 }
 0x17b   : > { %v394_v19 = vadd.f32 %v389_v58, %v373_v11 }
 0x17e   : > { %v391_v63 = vpop.permute.xlu1 %390  ;;  %v410_v2 = vpop.permute.xlu0 %409 }
 0x17f   : > { %v415_v23 = vadd.f32 %v410_v2, %v394_v19  ;;  %v395_v17 = vadd.f32 %v391_v63, %v374_v61 }
 0x181   : > { %v433_v22 = vadd.f32 %v1854_v29, %v415_v23  ;;  %v484_v29 = vmul.f32 %v482_v26, %v1645_v28 }
 0x182   : > { %v412_v53 = vpop.permute.xlu1 %411  ;;  %v449_v49 = vpop.permute.xlu0 %448 }
 0x183   : > { %v416_v24 = vadd.f32 %v412_v53, %v395_v17  ;;  %v454_v0 = vadd.f32 %v449_v49, %v433_v22 }
 0x185   : > { %v434_v7 = vadd.f32 %v1857_v31, %v416_v24 }
 0x186   : > { %v451_v9 = vpop.permute.xlu1 %450  ;;  %v470_v27 = vpop.permute.xlu0 %469 }
 0x187   : > { %v475_v4 = vadd.f32 %v470_v27, %v454_v0  ;;  %v455_v36 = vadd.f32 %v451_v9, %v434_v7 }
 0x189   : > { %v485_v38 = vadd.f32 %v483_v50, %v475_v4 }
 0x18a   : > { %v472_v39 = vpop.permute.xlu1 %471  ;;  %v2044_v42 = vpop.permute.xlu0 %805 }
 0x18b   : > { %v499_v43 = vadd.f32 %v494_v25, %v485_v38  ;;  %v476_v1 = vadd.f32 %v472_v39, %v455_v36 }
 0x18d   : > { %v486_v45 = vadd.f32 %v484_v29, %v476_v1  ;;  %v513_v12 = vadd.f32 %v508_v16, %v499_v43  ;;  %v638_v16 = vstv %s1125_s7 }
 0x18e   : > { %v2047_v52 = vpop.permute.xlu1 %807  ;;  %v546_v56 = vpop.permute.xlu0 %545  ;;  %v639_v63 = vmul.f32 %v638_v16, %v1658_v30  ;;  %v640_v53 = vmul.f32 %v638_v16, %v1682_v35 }
 0x18f   : > { %v500_v31 = vadd.f32 %v496_v13, %v486_v45  ;;  %v530_v57 = vadd.f32 %v1877_v48, %v513_v12 }
 0x191   : > { %v551_v20 = vadd.f32 %v546_v56, %v530_v57  ;;  %v514_v34 = vadd.f32 %v510_v46, %v500_v31 }
 0x192   : > { %v548_v59 = vpop.permute.xlu1 %547  ;;  %v567_v6 = vpop.permute.xlu0 %566 }
 0x193   : > { %v531_v47 = vadd.f32 %v1882_v62, %v514_v34  ;;  %v572_v11 = vadd.f32 %v567_v6, %v551_v20 }
 0x195   : > { %v552_v60 = vadd.f32 %v548_v59, %v531_v47  ;;  %v589_v28 = vadd.f32 %v1893_v3, %v572_v11 }
 0x196   : > { %v569_v25 = vpop.permute.xlu1 %568  ;;  %v605_v51 = vpop.permute.xlu0 %604 }
 0x197   : > { %v573_v61 = vadd.f32 %v569_v25, %v552_v60  ;;  %v610_v58 = vadd.f32 %v605_v51, %v589_v28 }
 0x199   : > { %v590_v13 = vadd.f32 %v1896_v8, %v573_v61 }
 0x19a   : > { %v607_v19 = vpop.permute.xlu1 %606  ;;  %v626_v48 = vpop.permute.xlu0 %625 }
 0x19b   : > { %v631_v46 = vadd.f32 %v626_v48, %v610_v58  ;;  %v611_v2 = vadd.f32 %v607_v19, %v590_v13  ;;  %v948_v19 = vstv %s1107_s20 }
 0x19d   : > { %v641_v23 = vadd.f32 %v639_v63, %v631_v46 }
 0x19e   : > { %v628_v17 = vpop.permute.xlu1 %627  ;;  %v702_v62 = vpop.permute.xlu0 %701 }
 0x19f   : > { %v655_v22 = vadd.f32 %v650_v10, %v641_v23  ;;  %v632_v3 = vadd.f32 %v628_v17, %v611_v2 }
 0x1a1   : > { %v642_v49 = vadd.f32 %v640_v53, %v632_v3  ;;  %v669_v24 = vadd.f32 %v664_v14, %v655_v22  ;;  %v794_v14 = vstv %s1134_s11 }
 0x1a2   : > { %v704_v26 = vpop.permute.xlu1 %703  ;;  %v723_v0 = vpop.permute.xlu0 %722 }
 0x1a3   : > { %v656_v8 = vadd.f32 %v2037_v37, %v642_v49  ;;  %v686_v7 = vadd.f32 %v1911_v40, %v669_v24  ;;  %v795_v40 = vmul.f32 %v794_v14, %v1778_v33 }
 0x1a5   : > { %v707_v9 = vadd.f32 %v702_v62, %v686_v7  ;;  %v670_v30 = vadd.f32 %v2039_v21, %v656_v8 }
 0x1a6   : > { %v725_v27 = vpop.permute.xlu1 %724  ;;  %v761_v50 = vpop.permute.xlu0 %760 }
 0x1a7   : > { %v687_v4 = vadd.f32 %v1914_v55, %v670_v30  ;;  %v728_v10 = vadd.f32 %v723_v0, %v707_v9  ;;  %v796_v55 = vmul.f32 %v794_v14, %v1784_v41 }
 0x1a9   : > { %v708_v36 = vadd.f32 %v704_v26, %v687_v4  ;;  %v745_v35 = vadd.f32 %v1924_v5, %v728_v10 }
 0x1aa   : > { %v763_v38 = vpop.permute.xlu1 %762  ;;  %v782_v39 = vpop.permute.xlu0 %781 }
 0x1ab   : > { %v729_v43 = vadd.f32 %v725_v27, %v708_v36  ;;  %v766_v29 = vadd.f32 %v761_v50, %v745_v35 }
 0x1ad   : > { %v746_v37 = vadd.f32 %v1931_v32, %v729_v43  ;;  %v787_v1 = vadd.f32 %v782_v39, %v766_v29 }
 0x1ae   : > { %v784_v45 = vpop.permute.xlu1 %783  ;;  %v820_v21 = vpop.permute.xlu0 %819 }
 0x1af   : > { %v767_v12 = vadd.f32 %v763_v38, %v746_v37  ;;  %v797_v56 = vadd.f32 %v795_v40, %v787_v1 }
 0x1b1   : > { %v788_v31 = vadd.f32 %v784_v45, %v767_v12  ;;  %v811_v57 = vadd.f32 %v2044_v42, %v797_v56 }
 0x1b2   : > { %v822_v5 = vpop.permute.xlu1 %821  ;;  %v858_v20 = vpop.permute.xlu0 %857 }
 0x1b3   : > { %v798_v34 = vadd.f32 %v796_v55, %v788_v31  ;;  %v825_v59 = vadd.f32 %v820_v21, %v811_v57 }
 0x1b5   : > { %v812_v6 = vadd.f32 %v2047_v52, %v798_v34  ;;  %v842_v32 = vadd.f32 %v1942_v44, %v825_v59  ;;  %v945_v52 = vstv %s318_s13 }
 0x1b6   : > { %v860_v47 = vpop.permute.xlu1 %859  ;;  %v879_v33 = vpop.permute.xlu0 %878 }
 0x1b7   : > { %v826_v11 = vadd.f32 %v822_v5, %v812_v6  ;;  %v863_v60 = vadd.f32 %v858_v20, %v842_v32 }
 0x1b9   : > { %v843_v28 = vadd.f32 %v1947_v15, %v826_v11  ;;  %v884_v41 = vadd.f32 %v879_v33, %v863_v60 }
 0x1ba   : > { %v881_v25 = vpop.permute.xlu1 %880  ;;  %v917_v51 = vpop.permute.xlu0 %916 }
 0x1bb   : > { %v864_v42 = vadd.f32 %v860_v47, %v843_v28  ;;  %v901_v61 = vadd.f32 %v1950_v18, %v884_v41 }
 0x1bd   : > { %v885_v16 = vadd.f32 %v881_v25, %v864_v42  ;;  %v922_v58 = vadd.f32 %v917_v51, %v901_v61 }
 0x1be   : > { %v919_v13 = vpop.permute.xlu1 %918  ;;  %v938_v44 = vpop.permute.xlu0 %937 }
 0x1bf   : > { %v902_v48 = vadd.f32 %v1953_v54, %v885_v16  ;;  %v943_v63 = vadd.f32 %v938_v44, %v922_v58 }
 0x1c1   : > { %v923_v46 = vadd.f32 %v919_v13, %v902_v48  ;;  %v946_v2 = vadd.f32 %v945_v52, %v943_v63  ;;  %v949_v23 = vadd.f32 %v948_v19, %v943_v63 }
 0x1c2   : > { %v940_v15 = vpop.permute.xlu1 %939 }
 0x1c3   : > { %v951_v17 = vmul.f32 %v946_v2, %v946_v2  ;;  %v953_v62 = vmul.f32 %v949_v23, %v949_v23  ;;  %v944_v22 = vadd.f32 %v940_v15, %v923_v46 }
 0x1c5   : > { %v955_v53 = vadd.f32 %v953_v62, %v951_v17  ;;  %v947_v18 = vadd.f32 %v945_v52, %v944_v22  ;;  %v950_v3 = vadd.f32 %v948_v19, %v944_v22 }
 0x1c7   : > { %1235 = vrsqrt.f32 %v955_v53  ;;  %v952_v49 = vmul.f32 %v947_v18, %v947_v18  ;;  %v954_v24 = vmul.f32 %v950_v3, %v950_v3  ;;  %vm959_vm5 = vcmp.eq.f32.partialorder %v955_v53, inf }
 0x1c8   : > { %v962_v8 = vand.u32 2147483648, %v955_v53  ;;  %vm961_vm7 = vcmp.eq.f32.partialorder %v955_v53, 0.0 }
 0x1c9   : > { %v956_v26 = vadd.f32 %v954_v24, %v952_v49 }
 0x1cb   : > { %1237 = vrsqrt.f32 %v956_v26  ;;  %vm966_vm8 = vcmp.eq.f32.partialorder %v956_v26, inf  ;;  %v969_v50 = vand.u32 2147483648, %v956_v26  ;;  %vm968_vm9 = vcmp.eq.f32.partialorder %v956_v26, 0.0 }
 0x1d1   : > { %v1236_v54 = vpop.eup %1235 }
 0x1d2   : > { %v958_v0 = vmul.f32 %v1236_v54, %v955_v53 }
 0x1d4   : > { %v960_v7 = vsel %vm959_vm5, %v955_v53, %v958_v0 }
 0x1d5   : > { %v1238_v9 = vpop.eup %1237  ;;  %v963_v30 = vsel %vm961_vm7, %v962_v8, %v960_v7 }
 0x1d6   : > { %v965_v27 = vmul.f32 %v1238_v9, %v956_v26  ;;  %972 = vst.msk [vmem:[%s254_s26] sm:$0xff] %vm971_vm6, %v963_v30 }
 0x1d8   : > { %v967_v4 = vsel %vm966_vm8, %v956_v26, %v965_v27 }
 0x1d9   : > { %v970_v10 = vsel %vm968_vm9, %v969_v50, %v967_v4 }
 0x1da   : > { %973 = vst.msk [vmem:[%s254_s26 + $0x8] sm:$0xff] %vm971_vm6, %v970_v10 }
 0x1db   : > { %1327 = shalt.err (!%p1324_p8)
}
 0x1dc   : > { %s1328_s24 = scalar_lea.hbm %s2075_s28, 256  ;;  %s1332_s30 = scalar_lea.hbm %s2126_s4, 512 }
 0x1dd   : > { %p1329_p1 = scmp.ne.s32.totalorder %s2075_s28, %s1328_s24  ;;  %p1333_p13 = scmp.lt.u32.totalorder %s2075_s28, %s2126_s4 }
 0x1de   : > { %p1334_p7 = scmp.lt.u32.totalorder %s1332_s30, %s1328_s24  ;;  %p1336_p12 = scmp.lt.u32.totalorder %s1328_s24, %s2075_s28 }
 0x1df   : > { %p1330_p5 = pnand %p1329_p1, %p1529_p9 }
 0x1e0   : > { %p1335_p10 = por %p1334_p7, %p1333_p13 }
 0x1e1   : > { %p1331_p11 = pneg %p1330_p5 }
 0x1e2   : > { %p1337_p0 = por %p1336_p12, %p1335_p10 }
 0x1e4   : > { %p1338_p3 = pnand %p1337_p0, %p1331_p11 }
 0x1e6   : > { %1341 = shalt.err (!%p1338_p3)
}
 0x1e7   : > { %s1401_s7 = smov 128   ;;  %s1402_s11 = smov 8  }
 0x1e8   : > { %1164 = dma.vmem_to_hbm [thread:$0]  (%p1529_p9), %s2077_s6, 256, %s2075_s28, %s975_s19, %s1401_s7, %s1401_s7, %s1402_s11  }
 0x1e9 PF: > { %s1003_s13 = sand.u32 1, %s1376_s15   ;;  %p2158_p2 = scmp.ne.s32.totalorder %s2139_s22, 0 }
 0x1ea   : > { %p2159_p4 = scmp.ge.s32.totalorder %s1388_s18, 2  ;;  %s1004_s20 = scalar_lea.sflag [#allocation5], %s1003_s13 }
 0x1ec   : > { %p1181_p6 = pnand %p2159_p4, %p2158_p2 }
 0x1ee   : > { %1371 = dma.done.wait (!%p1181_p6), %s1004_s20, 256  }
 0x1ef   : > { %1373 = vsyncadd (!%p1181_p6), %s1004_s20, 4294967040  ;;  %s2160_s23 = sld [smem:[#allocation16_spill]]  ;;  %p19_p8 = scmp.ge.s32.totalorder %s1515_s14, 4  }
 0x1f0   : > { %s2161_s15 = smov %s1380_s16  ;;  %s2162_s16 = smov %s1384_s17 }
 0x1f1   : > { %s2164_s18 = smov %s1515_s14  ;;  %21 = sbr.rel (!%p19_p8) target bundleno = 12 (0xc), region = 97 }
 0x1f5   : > { %s2163_s17 = smov %s2160_s23 }
 0x1f8   :  { %1009 = vsyncpa [#allocation4], 1 }
 0x1f9   :  { %1011 = vsyncpa [#allocation4 + $0x1], 1 }
 0x1fa   :  { %1012 = vsyncpa [#allocation5], 1 }
 0x1fb   :  { %1014 = vsyncpa [#allocation5 + $0x1], 1 }
 0x1fc   :  { %1015 = vsyncpa [#allocation6], 1 }
 0x1fd   :  { %1017 = vsyncpa [#allocation6 + $0x1], 1 }
 0x1fe   :  { %1018 = vsyncpa [#allocation9], 1 }

</bundles_post_ra>
